<compile_context>
chip_gen: v7x
topology: tpu7x:2x2x1
jax: 0.10.0
libtpu: 0.0.40
codegen_flags: <defaults>
</compile_context>

<pallas_src>
import numpy as np
import jax
import jax.numpy as jnp
from jax import lax
from jax.experimental import pallas as pl


# -----------------------------------------------------------------------------
# Parameter construction (deterministic, mirrors the PyTorch __init__ shapes)
# -----------------------------------------------------------------------------
def _init_sepconv(key, cin, cout, K):
    k1, k2, k3, k4 = jax.random.split(key, 4)
    wdw = 0.3 * jax.random.normal(k1, (K, cin), jnp.float32)        # depthwise (k, cin)
    bdw = 0.1 * jax.random.normal(k2, (1, cin), jnp.float32)
    wpw = jax.random.normal(k3, (cin, cout), jnp.float32) / jnp.sqrt(cin)
    bpw = 0.1 * jax.random.normal(k4, (1, cout), jnp.float32)
    return dict(wdw=wdw, bdw=bdw, wpw=wpw, bpw=bpw)


def _init_block(key, cin, cout, K, num_convs):
    keys = jax.random.split(key, num_convs)
    return [_init_sepconv(keys[i], cin if i == 0 else cout, cout, K)
            for i in range(num_convs)]


def init_unet_params(key, num_of_filters, num_in_filters, K,
                     num_down_blocks, num_convs):
    keys = jax.random.split(key, 2 * num_down_blocks + 1)
    params = {"down": [], "up": []}
    for i in range(num_down_blocks):
        if i == 0:
            cin, cout = num_in_filters, num_of_filters
        else:
            cin, cout = 2 ** (i - 1) * num_of_filters, 2 ** i * num_of_filters
        params["down"].append(_init_block(keys[i], cin, cout, K, num_convs))
    num = 2 ** (num_down_blocks - 1) * num_of_filters
    params["bottom"] = _init_block(keys[num_down_blocks], num, num, K, num_convs)
    ki = num_down_blocks + 1
    for j in range(num_down_blocks - 1, -1, -1):
        if j == 0:
            cin, cout = 2 ** (j + 1) * num_of_filters, num_in_filters
        else:
            cin, cout = 2 ** (j + 1) * num_of_filters, 2 ** (j - 1) * num_of_filters
        params["up"].append(_init_block(keys[ki], cin, cout, K, num_convs))
        ki += 1
    return params


# -----------------------------------------------------------------------------
# Weight fusion: depthwise + pointwise -> one (K*Cin, Cout) matmul weight
# -----------------------------------------------------------------------------
def _fuse_sepconv(conv):
    wdw, bdw, wpw, bpw = conv["wdw"], conv["bdw"], conv["wpw"], conv["bpw"]
    K, cin = wdw.shape
    # W[(t, c), o] = wdw[t, c] * wpw[c, o]   (elementwise, exact in f32)
    w = (wdw[:, :, None] * wpw[None, :, :]).reshape(K * cin, wpw.shape[1])
    # b[o] = sum_c bdw[c] * wpw[c, o] + bpw[o]
    b = (bdw.reshape(cin, 1) * wpw).sum(axis=0, keepdims=True) + bpw
    return np.asarray(w, np.float32), np.asarray(b, np.float32)


def _layer_schedule(params, pooling_size, L0):
    """(channels, length) of every saved layer, in the PyTorch `layers` order."""
    ndb = len(params["down"])
    sched = []
    L = L0
    for i in range(ndb):
        sched.append((params["down"][i][-1]["wpw"].shape[1], L))
        L //= pooling_size
    sched.append((params["bottom"][-1]["wpw"].shape[1], L))
    for i in range(ndb):
        _, L = sched[ndb - i - 1]
        sched.append((params["up"][i][-1]["wpw"].shape[1], L))
    return sched


# -----------------------------------------------------------------------------
# One packed (rows, 128) f32 constant slab: weights, biases, selection
# matrices and boundary masks, with static 8-aligned row offsets.
# -----------------------------------------------------------------------------
class _SlabPacker:
    def __init__(self):
        self._rows = 0
        self._entries = []
        self.index = {}

    def add(self, name, arr):
        arr = np.asarray(arr, np.float32)
        assert arr.ndim == 2 and arr.shape[1] <= 128, (name, arr.shape)
        off = self._rows
        self.index[name] = (off, arr.shape[0], arr.shape[1])
        self._entries.append((off, arr))
        self._rows = ((off + arr.shape[0] + 7) // 8) * 8    # 8-aligned offsets

    def finalize(self):
        rows = max(8, self._rows)
        slab = np.zeros((rows, 128), np.float32)
        for off, arr in self._entries:
            slab[off:off + arr.shape[0], :arr.shape[1]] = arr
        return jnp.asarray(slab), dict(self.index)


# -----------------------------------------------------------------------------
# Fully fused UNet forward: one pallas_call, everything resident in VMEM
# -----------------------------------------------------------------------------
def unet_forward_pallas(x_ncl, params, K, pooling_size, num_down_blocks,
                        layer_id=-1):
    B, Cin, L0 = x_ncl.shape
    ndb = num_down_blocks
    P = pooling_size
    pad = K // 2
    f32 = jnp.float32

    sched = _layer_schedule(params, P, L0)
    c_out, L_out = sched[layer_id]
    Ls = [L0 // P ** k for k in range(ndb + 1)]        # segment length per level
    assert pad < min(Ls), "kernel half-width must be smaller than L at the bottleneck"

    n_down = [len(b) for b in params["down"]]
    n_bot = len(params["bottom"])
    n_up = [len(b) for b in params["up"]]

    # Sanity: lane-concat [x_up | res] must match the un-split fused weight
    # channel ordering of each up block's first conv.
    prev_c = params["bottom"][-1]["wpw"].shape[1]
    for i, blk in enumerate(params["up"]):
        res_c = params["down"][ndb - i - 1][-1]["wpw"].shape[1]
        assert blk[0]["wdw"].shape[1] == prev_c + res_c
        prev_c = blk[-1]["wpw"].shape[1]

    # ---- pack every constant into one slab (single DMA) ---------------------
    packer = _SlabPacker()

    def add_conv(name, conv):
        w, b = _fuse_sepconv(conv)
        packer.add(name + "_w", w)
        packer.add(name + "_b", b)

    for i, blk in enumerate(params["down"]):
        for j, conv in enumerate(blk):
            add_conv(f"down{i}_conv{j}", conv)
    for j, conv in enumerate(params["bottom"]):
        add_conv(f"bottom_conv{j}", conv)
    for i, blk in enumerate(params["up"]):
        for j, conv in enumerate(blk):
            add_conv(f"up{i}_conv{j}", conv)

    # MaxPool decimation matrices (pick row b*L + P*j), one per down level.
    for i in range(ndb):
        L, Lh = Ls[i], Ls[i + 1]
        dec = np.zeros((B * Lh, B * L), np.float32)
        for b in range(B):
            for j in range(Lh):
                dec[b * Lh + j, b * L + P * j] = 1.0
        packer.add(f"pool{i}_dec", dec)

    # Nearest-neighbour upsample (+ zero right-pad) selection matrices.
    for i in range(ndb):
        L_small, L_new = Ls[ndb - i], Ls[ndb - 1 - i]
        up = np.zeros((B * L_new, B * L_small), np.float32)
        for b in range(B):
            for l in range(L_new):
                j = l // P
                if j < L_small:
                    up[b * L_new + l, b * L_small + j] = 1.0
        packer.add(f"up{i}_sel", up)

    # im2col boundary masks, one (B*L, 1) column per (segment length, offset).
    for Lm in sorted(set(Ls)):
        for off in range(-pad, pad + 1):
            if off == 0:
                continue
            m = np.zeros((B * Lm, 1), np.float32)
            for r in range(B * Lm):
                if 0 <= (r % Lm) + off < Lm:
                    m[r, 0] = 1.0
            packer.add(f"mask_L{Lm}_off{off}", m)

    slab, slab_index = packer.finalize()

    CONV_PREC = lax.Precision.DEFAULT    # single bf16 MXU pass per conv matmul
    SEL_PREC = lax.Precision.HIGHEST     # exact pass-through of 0/1 picks

    def kernel(x_ref, slab_ref, o_ref):
        def cget(name):
            off, nr, nc = slab_index[name]
            return slab_ref[off:off + nr, :nc]          # static, 8-aligned slice

        def cshift(xf, o):
            # circular row shift: y[r] = xf[(r + o) mod BL], static 0 < o < BL
            return jnp.concatenate([xf[o:, :], xf[:o, :]], axis=0)

        def shift_rows(xf, off, Lc):
            # y[(b,l)] = xf[(b,l+off)], zero outside the length-Lc segment.
            if off == 0:
                return xf
            sh = cshift(xf, off % xf.shape[0])
            return sh * cget(f"mask_L{Lc}_off{off}")    # precomputed (BL,1) mask

        def sepconv(xf, name, Lc):
            # Fused depthwise-separable conv + ReLU as ONE (BL,K*C)@(K*C,O) matmul.
            cols = jnp.concatenate(
                [shift_rows(xf, t - pad, Lc) for t in range(K)], axis=1)
            y = jnp.dot(cols, cget(name + "_w"),
                        preferred_element_type=f32, precision=CONV_PREC)
            return jnp.maximum(y + cget(name + "_b"), 0.0)

        def maxpool(xf, lvl):
            # (P-1) shifted VPU maxima + one precomputed decimation matmul.
            pm = xf
            for s in range(1, P):
                pm = jnp.maximum(pm, cshift(xf, s))
            return jnp.dot(cget(f"pool{lvl}_dec"), pm,
                           preferred_element_type=f32, precision=SEL_PREC)

        def upsample(xf, lvl):
            return jnp.dot(cget(f"up{lvl}_sel"), xf,
                           preferred_element_type=f32, precision=SEL_PREC)

        h = x_ref[...]                                   # (B*L0, Cin) rows
        Lc = L0
        skips, saved = [], []
        # Down path.
        for i in range(ndb):
            for j in range(n_down[i]):
                h = sepconv(h, f"down{i}_conv{j}", Lc)
            skips.append((h, Lc))
            saved.append((h, Lc))
            h = maxpool(h, i)
            Lc //= P
        # Bottom block.
        for j in range(n_bot):
            h = sepconv(h, f"bottom_conv{j}", Lc)
        saved.append((h, Lc))
        # Up path: skip connection = lane (channel) concat [x_up | res].
        for i in range(ndb):
            res, L_res = skips[ndb - 1 - i]
            hx = upsample(h, i)
            h = jnp.concatenate([hx, res], axis=1)
            for j in range(n_up[i]):
                h = sepconv(h, f"up{i}_conv{j}", L_res)
            Lc = L_res
            saved.append((h, Lc))

        out_rows, _ = saved[layer_id]
        o_ref[...] = out_rows.astype(o_ref.dtype)

    # Layout plumbing stays in XLA: NCL -> flat channel-last rows and back.
    x_rows = jnp.transpose(x_ncl, (0, 2, 1)).reshape(B * L0, Cin)

    out_rows = pl.pallas_call(
        kernel,
        out_shape=jax.ShapeDtypeStruct((B * L_out, c_out), x_ncl.dtype),
    )(x_rows, slab)

    return jnp.transpose(out_rows.reshape(B, L_out, c_out), (0, 2, 1))


# -----------------------------------------------------------------------------
# Pure-JAX reference (NCL layout, lax.conv, full f32) for correctness checking
# -----------------------------------------------------------------------------
def _ref_sepconv(x_ncl, conv, K, relu):
    cin = conv["wdw"].shape[1]
    pad = K // 2
    w_dw = jnp.transpose(conv["wdw"], (1, 0))[:, None, :]          # (Cin, 1, K)
    y = lax.conv_general_dilated(
        x_ncl, w_dw, window_strides=(1,), padding=[(pad, pad)],
        dimension_numbers=("NCH", "OIH", "NCH"), feature_group_count=cin,
        precision=lax.Precision.HIGHEST)
    y = y + conv["bdw"].reshape(1, cin, 1)
    w_pw = jnp.transpose(conv["wpw"], (1, 0))[:, :, None]          # (Cout, Cin, 1)
    y = lax.conv_general_dilated(
        y, w_pw, window_strides=(1,), padding=[(0, 0)],
        dimension_numbers=("NCH", "OIH", "NCH"),
        precision=lax.Precision.HIGHEST)
    y = y + conv["bpw"].reshape(1, -1, 1)
    if relu:
        y = jnp.maximum(y, 0.0)
    return y


def _ref_block(x_ncl, block_params, K):
    for conv in block_params:
        x_ncl = _ref_sepconv(x_ncl, conv, K, relu=True)
    return x_ncl


def unet_forward_ref(x_ncl, params, K, pooling_size, num_down_blocks,
                     layer_id=-1):
    x = x_ncl
    layers = []
    for i in range(num_down_blocks):
        x = _ref_block(x, params["down"][i], K)
        layers.append(x)
        B, C, L = x.shape
        Lout = L // pooling_size
        x = x[:, :, :Lout * pooling_size].reshape(B, C, Lout, pooling_size).max(-1)
    x = _ref_block(x, params["bottom"], K)
    layers.append(x)
    for i in range(num_down_blocks):
        x = jnp.repeat(x, pooling_size, axis=2)
        res = layers[num_down_blocks - i - 1]
        pdiff = res.shape[2] - x.shape[2]
        if pdiff > 0:
            x = jnp.pad(x, ((0, 0), (0, 0), (0, pdiff)))
        x = jnp.concatenate([x, res], axis=1)
        x = _ref_block(x, params["up"][i], K)
        layers.append(x)
    return layers[layer_id]


# -----------------------------------------------------------------------------
# Main
# -----------------------------------------------------------------------------
if __name__ == "__main__":
    num_of_filters = 8
    num_in_filters = 4
    kernel_size_CNN = 3
    num_down_blocks = 2
    num_convolutions_per_block = 2
    pooling_size = 2
    batch = 2
    length = 16

    key = jax.random.PRNGKey(0)
    k_x, k_p = jax.random.split(key)
    x = jax.random.normal(k_x, (batch, num_in_filters, length), jnp.float32)

    params = init_unet_params(k_p, num_of_filters, num_in_filters,
                              kernel_size_CNN, num_down_blocks,
                              num_convolutions_per_block)

    out = unet_forward_pallas(x, params, kernel_size_CNN, pooling_size,
                              num_down_blocks)
    out = jax.block_until_ready(out)

    ref = unet_forward_ref(x, params, kernel_size_CNN, pooling_size,
                           num_down_blocks)
    ref = jax.block_until_ready(ref)

    assert out.shape == (batch, num_in_filters, length), out.shape
    # Tolerance accounts for the conv matmuls running at Precision.DEFAULT
    # (single bf16 MXU pass, per the perf review); structural bugs produce
    # errors orders of magnitude larger than this.
    max_err = float(jnp.max(jnp.abs(out - ref)))
    assert jnp.allclose(out, ref, atol=3e-2, rtol=3e-2), max_err

    print("KERNEL_OK")
</pallas_src>

<mosaic_0001>
module attributes {stable_mosaic.version = 11 : i64} {
  func.func @kernel(%arg0: memref<32x4xf32, #tpu.memory_space<vmem>>, %arg1: memref<656x128xf32, #tpu.memory_space<vmem>>, %arg2: memref<32x4xf32, #tpu.memory_space<vmem>>) attributes {dimension_semantics = [], scalar_prefetch = 0 : i64, scratch_operands = 0 : i64, tpu.core_type = #tpu.core_type<tc>} {
    %c0 = arith.constant 0 : index
    %c0_0 = arith.constant 0 : index
    %0 = vector.load %arg0[%c0, %c0_0] : memref<32x4xf32, #tpu.memory_space<vmem>>, vector<32x4xf32>
    %1 = vector.extract_strided_slice %0 {offsets = [31, 0], sizes = [1, 4], strides = [1, 1]} : vector<32x4xf32> to vector<1x4xf32>
    %2 = vector.extract_strided_slice %0 {offsets = [0, 0], sizes = [31, 4], strides = [1, 1]} : vector<32x4xf32> to vector<31x4xf32>
    %3 = tpu.concatenate %1, %2 in 0 : vector<1x4xf32>, vector<31x4xf32> -> vector<32x4xf32>
    %c592 = arith.constant 592 : index
    %c0_1 = arith.constant 0 : index
    %4 = vector.load %arg1[%c592, %c0_1] : memref<656x128xf32, #tpu.memory_space<vmem>>, vector<32x1xf32>
    %5 = vector.broadcast %4 : vector<32x1xf32> to vector<32x4xf32>
    %6 = arith.mulf %3, %5 : vector<32x4xf32>
    %7 = vector.extract_strided_slice %0 {offsets = [1, 0], sizes = [31, 4], strides = [1, 1]} : vector<32x4xf32> to vector<31x4xf32>
    %8 = vector.extract_strided_slice %0 {offsets = [0, 0], sizes = [1, 4], strides = [1, 1]} : vector<32x4xf32> to vector<1x4xf32>
    %9 = tpu.concatenate %7, %8 in 0 : vector<31x4xf32>, vector<1x4xf32> -> vector<32x4xf32>
    %c624 = arith.constant 624 : index
    %c0_2 = arith.constant 0 : index
    %10 = vector.load %arg1[%c624, %c0_2] : memref<656x128xf32, #tpu.memory_space<vmem>>, vector<32x1xf32>
    %11 = vector.broadcast %10 : vector<32x1xf32> to vector<32x4xf32>
    %12 = arith.mulf %9, %11 : vector<32x4xf32>
    %13 = tpu.concatenate %6, %0, %12 in 1 : vector<32x4xf32>, vector<32x4xf32>, vector<32x4xf32> -> vector<32x12xf32>
    %c0_3 = arith.constant 0 : index
    %c0_4 = arith.constant 0 : index
    %14 = vector.load %arg1[%c0_3, %c0_4] : memref<656x128xf32, #tpu.memory_space<vmem>>, vector<12x8xf32>
    %cst = arith.constant dense<0.000000e+00> : vector<32x8xf32>
    %15 = tpu.matmul %13, %14, %cst {dimension_numbers = #tpu.dot_dimension_numbers<[1], [0], [0], [1], [0, 0, 1, 1], [], []>} : vector<32x12xf32>, vector<12x8xf32>, vector<32x8xf32> -> vector<32x8xf32>
    %c16 = arith.constant 16 : index
    %c0_5 = arith.constant 0 : index
    %16 = vector.load %arg1[%c16, %c0_5] : memref<656x128xf32, #tpu.memory_space<vmem>>, vector<1x8xf32>
    %17 = vector.broadcast %16 : vector<1x8xf32> to vector<32x8xf32>
    %18 = arith.addf %15, %17 : vector<32x8xf32>
    %cst_6 = arith.constant 0.000000e+00 : f32
    %19 = vector.broadcast %cst_6 : f32 to vector<32x8xf32>
    %20 = arith.maximumf %18, %19 : vector<32x8xf32>
    %21 = vector.extract_strided_slice %20 {offsets = [31, 0], sizes = [1, 8], strides = [1, 1]} : vector<32x8xf32> to vector<1x8xf32>
    %22 = vector.extract_strided_slice %20 {offsets = [0, 0], sizes = [31, 8], strides = [1, 1]} : vector<32x8xf32> to vector<31x8xf32>
    %23 = tpu.concatenate %21, %22 in 0 : vector<1x8xf32>, vector<31x8xf32> -> vector<32x8xf32>
    %c592_7 = arith.constant 592 : index
    %c0_8 = arith.constant 0 : index
    %24 = vector.load %arg1[%c592_7, %c0_8] : memref<656x128xf32, #tpu.memory_space<vmem>>, vector<32x1xf32>
    %25 = vector.broadcast %24 : vector<32x1xf32> to vector<32x8xf32>
    %26 = arith.mulf %23, %25 : vector<32x8xf32>
    %27 = vector.extract_strided_slice %20 {offsets = [1, 0], sizes = [31, 8], strides = [1, 1]} : vector<32x8xf32> to vector<31x8xf32>
    %28 = vector.extract_strided_slice %20 {offsets = [0, 0], sizes = [1, 8], strides = [1, 1]} : vector<32x8xf32> to vector<1x8xf32>
    %29 = tpu.concatenate %27, %28 in 0 : vector<31x8xf32>, vector<1x8xf32> -> vector<32x8xf32>
    %c624_9 = arith.constant 624 : index
    %c0_10 = arith.constant 0 : index
    %30 = vector.load %arg1[%c624_9, %c0_10] : memref<656x128xf32, #tpu.memory_space<vmem>>, vector<32x1xf32>
    %31 = vector.broadcast %30 : vector<32x1xf32> to vector<32x8xf32>
    %32 = arith.mulf %29, %31 : vector<32x8xf32>
    %33 = tpu.concatenate %26, %20, %32 in 1 : vector<32x8xf32>, vector<32x8xf32>, vector<32x8xf32> -> vector<32x24xf32>
    %c24 = arith.constant 24 : index
    %c0_11 = arith.constant 0 : index
    %34 = vector.load %arg1[%c24, %c0_11] : memref<656x128xf32, #tpu.memory_space<vmem>>, vector<24x8xf32>
    %cst_12 = arith.constant dense<0.000000e+00> : vector<32x8xf32>
    %35 = tpu.matmul %33, %34, %cst_12 {dimension_numbers = #tpu.dot_dimension_numbers<[1], [0], [0], [1], [0, 0, 1, 1], [], []>} : vector<32x24xf32>, vector<24x8xf32>, vector<32x8xf32> -> vector<32x8xf32>
    %c48 = arith.constant 48 : index
    %c0_13 = arith.constant 0 : index
    %36 = vector.load %arg1[%c48, %c0_13] : memref<656x128xf32, #tpu.memory_space<vmem>>, vector<1x8xf32>
    %37 = vector.broadcast %36 : vector<1x8xf32> to vector<32x8xf32>
    %38 = arith.addf %35, %37 : vector<32x8xf32>
    %cst_14 = arith.constant 0.000000e+00 : f32
    %39 = vector.broadcast %cst_14 : f32 to vector<32x8xf32>
    %40 = arith.maximumf %38, %39 : vector<32x8xf32>
    %41 = vector.extract_strided_slice %40 {offsets = [1, 0], sizes = [31, 8], strides = [1, 1]} : vector<32x8xf32> to vector<31x8xf32>
    %42 = vector.extract_strided_slice %40 {offsets = [0, 0], sizes = [1, 8], strides = [1, 1]} : vector<32x8xf32> to vector<1x8xf32>
    %43 = tpu.concatenate %41, %42 in 0 : vector<31x8xf32>, vector<1x8xf32> -> vector<32x8xf32>
    %44 = arith.maximumf %40, %43 : vector<32x8xf32>
    %c472 = arith.constant 472 : index
    %c0_15 = arith.constant 0 : index
    %45 = vector.load %arg1[%c472, %c0_15] : memref<656x128xf32, #tpu.memory_space<vmem>>, vector<16x32xf32>
    %cst_16 = arith.constant dense<0.000000e+00> : vector<16x8xf32>
    %46 = tpu.matmul %45, %44, %cst_16 {dimension_numbers = #tpu.dot_dimension_numbers<[1], [0], [0], [1], [0, 0, 1, 1], [], []>, precision = #tpu.contract_precision<fp32>} : vector<16x32xf32>, vector<32x8xf32>, vector<16x8xf32> -> vector<16x8xf32>
    %47 = vector.extract_strided_slice %46 {offsets = [15, 0], sizes = [1, 8], strides = [1, 1]} : vector<16x8xf32> to vector<1x8xf32>
    %48 = vector.extract_strided_slice %46 {offsets = [0, 0], sizes = [15, 8], strides = [1, 1]} : vector<16x8xf32> to vector<15x8xf32>
    %49 = tpu.concatenate %47, %48 in 0 : vector<1x8xf32>, vector<15x8xf32> -> vector<16x8xf32>
    %c560 = arith.constant 560 : index
    %c0_17 = arith.constant 0 : index
    %50 = vector.load %arg1[%c560, %c0_17] : memref<656x128xf32, #tpu.memory_space<vmem>>, vector<16x1xf32>
    %51 = vector.broadcast %50 : vector<16x1xf32> to vector<16x8xf32>
    %52 = arith.mulf %49, %51 : vector<16x8xf32>
    %53 = vector.extract_strided_slice %46 {offsets = [1, 0], sizes = [15, 8], strides = [1, 1]} : vector<16x8xf32> to vector<15x8xf32>
    %54 = vector.extract_strided_slice %46 {offsets = [0, 0], sizes = [1, 8], strides = [1, 1]} : vector<16x8xf32> to vector<1x8xf32>
    %55 = tpu.concatenate %53, %54 in 0 : vector<15x8xf32>, vector<1x8xf32> -> vector<16x8xf32>
    %c576 = arith.constant 576 : index
    %c0_18 = arith.constant 0 : index
    %56 = vector.load %arg1[%c576, %c0_18] : memref<656x128xf32, #tpu.memory_space<vmem>>, vector<16x1xf32>
    %57 = vector.broadcast %56 : vector<16x1xf32> to vector<16x8xf32>
    %58 = arith.mulf %55, %57 : vector<16x8xf32>
    %59 = tpu.concatenate %52, %46, %58 in 1 : vector<16x8xf32>, vector<16x8xf32>, vector<16x8xf32> -> vector<16x24xf32>
    %c56 = arith.constant 56 : index
    %c0_19 = arith.constant 0 : index
    %60 = vector.load %arg1[%c56, %c0_19] : memref<656x128xf32, #tpu.memory_space<vmem>>, vector<24x16xf32>
    %cst_20 = arith.constant dense<0.000000e+00> : vector<16x16xf32>
    %61 = tpu.matmul %59, %60, %cst_20 {dimension_numbers = #tpu.dot_dimension_numbers<[1], [0], [0], [1], [0, 0, 1, 1], [], []>} : vector<16x24xf32>, vector<24x16xf32>, vector<16x16xf32> -> vector<16x16xf32>
    %c80 = arith.constant 80 : index
    %c0_21 = arith.constant 0 : index
    %62 = vector.load %arg1[%c80, %c0_21] : memref<656x128xf32, #tpu.memory_space<vmem>>, vector<1x16xf32>
    %63 = vector.broadcast %62 : vector<1x16xf32> to vector<16x16xf32>
    %64 = arith.addf %61, %63 : vector<16x16xf32>
    %cst_22 = arith.constant 0.000000e+00 : f32
    %65 = vector.broadcast %cst_22 : f32 to vector<16x16xf32>
    %66 = arith.maximumf %64, %65 : vector<16x16xf32>
    %67 = vector.extract_strided_slice %66 {offsets = [15, 0], sizes = [1, 16], strides = [1, 1]} : vector<16x16xf32> to vector<1x16xf32>
    %68 = vector.extract_strided_slice %66 {offsets = [0, 0], sizes = [15, 16], strides = [1, 1]} : vector<16x16xf32> to vector<15x16xf32>
    %69 = tpu.concatenate %67, %68 in 0 : vector<1x16xf32>, vector<15x16xf32> -> vector<16x16xf32>
    %c560_23 = arith.constant 560 : index
    %c0_24 = arith.constant 0 : index
    %70 = vector.load %arg1[%c560_23, %c0_24] : memref<656x128xf32, #tpu.memory_space<vmem>>, vector<16x1xf32>
    %71 = vector.broadcast %70 : vector<16x1xf32> to vector<16x16xf32>
    %72 = arith.mulf %69, %71 : vector<16x16xf32>
    %73 = vector.extract_strided_slice %66 {offsets = [1, 0], sizes = [15, 16], strides = [1, 1]} : vector<16x16xf32> to vector<15x16xf32>
    %74 = vector.extract_strided_slice %66 {offsets = [0, 0], sizes = [1, 16], strides = [1, 1]} : vector<16x16xf32> to vector<1x16xf32>
    %75 = tpu.concatenate %73, %74 in 0 : vector<15x16xf32>, vector<1x16xf32> -> vector<16x16xf32>
    %c576_25 = arith.constant 576 : index
    %c0_26 = arith.constant 0 : index
    %76 = vector.load %arg1[%c576_25, %c0_26] : memref<656x128xf32, #tpu.memory_space<vmem>>, vector<16x1xf32>
    %77 = vector.broadcast %76 : vector<16x1xf32> to vector<16x16xf32>
    %78 = arith.mulf %75, %77 : vector<16x16xf32>
    %79 = tpu.concatenate %72, %66, %78 in 1 : vector<16x16xf32>, vector<16x16xf32>, vector<16x16xf32> -> vector<16x48xf32>
    %c88 = arith.constant 88 : index
    %c0_27 = arith.constant 0 : index
    %80 = vector.load %arg1[%c88, %c0_27] : memref<656x128xf32, #tpu.memory_space<vmem>>, vector<48x16xf32>
    %cst_28 = arith.constant dense<0.000000e+00> : vector<16x16xf32>
    %81 = tpu.matmul %79, %80, %cst_28 {dimension_numbers = #tpu.dot_dimension_numbers<[1], [0], [0], [1], [0, 0, 1, 1], [], []>} : vector<16x48xf32>, vector<48x16xf32>, vector<16x16xf32> -> vector<16x16xf32>
    %c136 = arith.constant 136 : index
    %c0_29 = arith.constant 0 : index
    %82 = vector.load %arg1[%c136, %c0_29] : memref<656x128xf32, #tpu.memory_space<vmem>>, vector<1x16xf32>
    %83 = vector.broadcast %82 : vector<1x16xf32> to vector<16x16xf32>
    %84 = arith.addf %81, %83 : vector<16x16xf32>
    %cst_30 = arith.constant 0.000000e+00 : f32
    %85 = vector.broadcast %cst_30 : f32 to vector<16x16xf32>
    %86 = arith.maximumf %84, %85 : vector<16x16xf32>
    %87 = vector.extract_strided_slice %86 {offsets = [1, 0], sizes = [15, 16], strides = [1, 1]} : vector<16x16xf32> to vector<15x16xf32>
    %88 = vector.extract_strided_slice %86 {offsets = [0, 0], sizes = [1, 16], strides = [1, 1]} : vector<16x16xf32> to vector<1x16xf32>
    %89 = tpu.concatenate %87, %88 in 0 : vector<15x16xf32>, vector<1x16xf32> -> vector<16x16xf32>
    %90 = arith.maximumf %86, %89 : vector<16x16xf32>
    %c488 = arith.constant 488 : index
    %c0_31 = arith.constant 0 : index
    %91 = vector.load %arg1[%c488, %c0_31] : memref<656x128xf32, #tpu.memory_space<vmem>>, vector<8x16xf32>
    %cst_32 = arith.constant dense<0.000000e+00> : vector<8x16xf32>
    %92 = tpu.matmul %91, %90, %cst_32 {dimension_numbers = #tpu.dot_dimension_numbers<[1], [0], [0], [1], [0, 0, 1, 1], [], []>, precision = #tpu.contract_precision<fp32>} : vector<8x16xf32>, vector<16x16xf32>, vector<8x16xf32> -> vector<8x16xf32>
    %93 = vector.extract_strided_slice %92 {offsets = [7, 0], sizes = [1, 16], strides = [1, 1]} : vector<8x16xf32> to vector<1x16xf32>
    %94 = vector.extract_strided_slice %92 {offsets = [0, 0], sizes = [7, 16], strides = [1, 1]} : vector<8x16xf32> to vector<7x16xf32>
    %95 = tpu.concatenate %93, %94 in 0 : vector<1x16xf32>, vector<7x16xf32> -> vector<8x16xf32>
    %c544 = arith.constant 544 : index
    %c0_33 = arith.constant 0 : index
    %96 = vector.load %arg1[%c544, %c0_33] : memref<656x128xf32, #tpu.memory_space<vmem>>, vector<8x1xf32>
    %97 = vector.broadcast %96 : vector<8x1xf32> to vector<8x16xf32>
    %98 = arith.mulf %95, %97 : vector<8x16xf32>
    %99 = vector.extract_strided_slice %92 {offsets = [1, 0], sizes = [7, 16], strides = [1, 1]} : vector<8x16xf32> to vector<7x16xf32>
    %100 = vector.extract_strided_slice %92 {offsets = [0, 0], sizes = [1, 16], strides = [1, 1]} : vector<8x16xf32> to vector<1x16xf32>
    %101 = tpu.concatenate %99, %100 in 0 : vector<7x16xf32>, vector<1x16xf32> -> vector<8x16xf32>
    %c552 = arith.constant 552 : index
    %c0_34 = arith.constant 0 : index
    %102 = vector.load %arg1[%c552, %c0_34] : memref<656x128xf32, #tpu.memory_space<vmem>>, vector<8x1xf32>
    %103 = vector.broadcast %102 : vector<8x1xf32> to vector<8x16xf32>
    %104 = arith.mulf %101, %103 : vector<8x16xf32>
    %105 = tpu.concatenate %98, %92, %104 in 1 : vector<8x16xf32>, vector<8x16xf32>, vector<8x16xf32> -> vector<8x48xf32>
    %c144 = arith.constant 144 : index
    %c0_35 = arith.constant 0 : index
    %106 = vector.load %arg1[%c144, %c0_35] : memref<656x128xf32, #tpu.memory_space<vmem>>, vector<48x16xf32>
    %cst_36 = arith.constant dense<0.000000e+00> : vector<8x16xf32>
    %107 = tpu.matmul %105, %106, %cst_36 {dimension_numbers = #tpu.dot_dimension_numbers<[1], [0], [0], [1], [0, 0, 1, 1], [], []>} : vector<8x48xf32>, vector<48x16xf32>, vector<8x16xf32> -> vector<8x16xf32>
    %c192 = arith.constant 192 : index
    %c0_37 = arith.constant 0 : index
    %108 = vector.load %arg1[%c192, %c0_37] : memref<656x128xf32, #tpu.memory_space<vmem>>, vector<1x16xf32>
    %109 = vector.broadcast %108 : vector<1x16xf32> to vector<8x16xf32>
    %110 = arith.addf %107, %109 : vector<8x16xf32>
    %cst_38 = arith.constant 0.000000e+00 : f32
    %111 = vector.broadcast %cst_38 : f32 to vector<8x16xf32>
    %112 = arith.maximumf %110, %111 : vector<8x16xf32>
    %113 = vector.extract_strided_slice %112 {offsets = [7, 0], sizes = [1, 16], strides = [1, 1]} : vector<8x16xf32> to vector<1x16xf32>
    %114 = vector.extract_strided_slice %112 {offsets = [0, 0], sizes = [7, 16], strides = [1, 1]} : vector<8x16xf32> to vector<7x16xf32>
    %115 = tpu.concatenate %113, %114 in 0 : vector<1x16xf32>, vector<7x16xf32> -> vector<8x16xf32>
    %c544_39 = arith.constant 544 : index
    %c0_40 = arith.constant 0 : index
    %116 = vector.load %arg1[%c544_39, %c0_40] : memref<656x128xf32, #tpu.memory_space<vmem>>, vector<8x1xf32>
    %117 = vector.broadcast %116 : vector<8x1xf32> to vector<8x16xf32>
    %118 = arith.mulf %115, %117 : vector<8x16xf32>
    %119 = vector.extract_strided_slice %112 {offsets = [1, 0], sizes = [7, 16], strides = [1, 1]} : vector<8x16xf32> to vector<7x16xf32>
    %120 = vector.extract_strided_slice %112 {offsets = [0, 0], sizes = [1, 16], strides = [1, 1]} : vector<8x16xf32> to vector<1x16xf32>
    %121 = tpu.concatenate %119, %120 in 0 : vector<7x16xf32>, vector<1x16xf32> -> vector<8x16xf32>
    %c552_41 = arith.constant 552 : index
    %c0_42 = arith.constant 0 : index
    %122 = vector.load %arg1[%c552_41, %c0_42] : memref<656x128xf32, #tpu.memory_space<vmem>>, vector<8x1xf32>
    %123 = vector.broadcast %122 : vector<8x1xf32> to vector<8x16xf32>
    %124 = arith.mulf %121, %123 : vector<8x16xf32>
    %125 = tpu.concatenate %118, %112, %124 in 1 : vector<8x16xf32>, vector<8x16xf32>, vector<8x16xf32> -> vector<8x48xf32>
    %c200 = arith.constant 200 : index
    %c0_43 = arith.constant 0 : index
    %126 = vector.load %arg1[%c200, %c0_43] : memref<656x128xf32, #tpu.memory_space<vmem>>, vector<48x16xf32>
    %cst_44 = arith.constant dense<0.000000e+00> : vector<8x16xf32>
    %127 = tpu.matmul %125, %126, %cst_44 {dimension_numbers = #tpu.dot_dimension_numbers<[1], [0], [0], [1], [0, 0, 1, 1], [], []>} : vector<8x48xf32>, vector<48x16xf32>, vector<8x16xf32> -> vector<8x16xf32>
    %c248 = arith.constant 248 : index
    %c0_45 = arith.constant 0 : index
    %128 = vector.load %arg1[%c248, %c0_45] : memref<656x128xf32, #tpu.memory_space<vmem>>, vector<1x16xf32>
    %129 = vector.broadcast %128 : vector<1x16xf32> to vector<8x16xf32>
    %130 = arith.addf %127, %129 : vector<8x16xf32>
    %cst_46 = arith.constant 0.000000e+00 : f32
    %131 = vector.broadcast %cst_46 : f32 to vector<8x16xf32>
    %132 = arith.maximumf %130, %131 : vector<8x16xf32>
    %c496 = arith.constant 496 : index
    %c0_47 = arith.constant 0 : index
    %133 = vector.load %arg1[%c496, %c0_47] : memref<656x128xf32, #tpu.memory_space<vmem>>, vector<16x8xf32>
    %cst_48 = arith.constant dense<0.000000e+00> : vector<16x16xf32>
    %134 = tpu.matmul %133, %132, %cst_48 {dimension_numbers = #tpu.dot_dimension_numbers<[1], [0], [0], [1], [0, 0, 1, 1], [], []>, precision = #tpu.contract_precision<fp32>} : vector<16x8xf32>, vector<8x16xf32>, vector<16x16xf32> -> vector<16x16xf32>
    %135 = tpu.concatenate %134, %86 in 1 : vector<16x16xf32>, vector<16x16xf32> -> vector<16x32xf32>
    %136 = vector.extract_strided_slice %135 {offsets = [15, 0], sizes = [1, 32], strides = [1, 1]} : vector<16x32xf32> to vector<1x32xf32>
    %137 = vector.extract_strided_slice %135 {offsets = [0, 0], sizes = [15, 32], strides = [1, 1]} : vector<16x32xf32> to vector<15x32xf32>
    %138 = tpu.concatenate %136, %137 in 0 : vector<1x32xf32>, vector<15x32xf32> -> vector<16x32xf32>
    %c560_49 = arith.constant 560 : index
    %c0_50 = arith.constant 0 : index
    %139 = vector.load %arg1[%c560_49, %c0_50] : memref<656x128xf32, #tpu.memory_space<vmem>>, vector<16x1xf32>
    %140 = vector.broadcast %139 : vector<16x1xf32> to vector<16x32xf32>
    %141 = arith.mulf %138, %140 : vector<16x32xf32>
    %142 = vector.extract_strided_slice %135 {offsets = [1, 0], sizes = [15, 32], strides = [1, 1]} : vector<16x32xf32> to vector<15x32xf32>
    %143 = vector.extract_strided_slice %135 {offsets = [0, 0], sizes = [1, 32], strides = [1, 1]} : vector<16x32xf32> to vector<1x32xf32>
    %144 = tpu.concatenate %142, %143 in 0 : vector<15x32xf32>, vector<1x32xf32> -> vector<16x32xf32>
    %c576_51 = arith.constant 576 : index
    %c0_52 = arith.constant 0 : index
    %145 = vector.load %arg1[%c576_51, %c0_52] : memref<656x128xf32, #tpu.memory_space<vmem>>, vector<16x1xf32>
    %146 = vector.broadcast %145 : vector<16x1xf32> to vector<16x32xf32>
    %147 = arith.mulf %144, %146 : vector<16x32xf32>
    %148 = tpu.concatenate %141, %135, %147 in 1 : vector<16x32xf32>, vector<16x32xf32>, vector<16x32xf32> -> vector<16x96xf32>
    %c256 = arith.constant 256 : index
    %c0_53 = arith.constant 0 : index
    %149 = vector.load %arg1[%c256, %c0_53] : memref<656x128xf32, #tpu.memory_space<vmem>>, vector<96x8xf32>
    %cst_54 = arith.constant dense<0.000000e+00> : vector<16x8xf32>
    %150 = tpu.matmul %148, %149, %cst_54 {dimension_numbers = #tpu.dot_dimension_numbers<[1], [0], [0], [1], [0, 0, 1, 1], [], []>} : vector<16x96xf32>, vector<96x8xf32>, vector<16x8xf32> -> vector<16x8xf32>
    %c352 = arith.constant 352 : index
    %c0_55 = arith.constant 0 : index
    %151 = vector.load %arg1[%c352, %c0_55] : memref<656x128xf32, #tpu.memory_space<vmem>>, vector<1x8xf32>
    %152 = vector.broadcast %151 : vector<1x8xf32> to vector<16x8xf32>
    %153 = arith.addf %150, %152 : vector<16x8xf32>
    %cst_56 = arith.constant 0.000000e+00 : f32
    %154 = vector.broadcast %cst_56 : f32 to vector<16x8xf32>
    %155 = arith.maximumf %153, %154 : vector<16x8xf32>
    %156 = vector.extract_strided_slice %155 {offsets = [15, 0], sizes = [1, 8], strides = [1, 1]} : vector<16x8xf32> to vector<1x8xf32>
    %157 = vector.extract_strided_slice %155 {offsets = [0, 0], sizes = [15, 8], strides = [1, 1]} : vector<16x8xf32> to vector<15x8xf32>
    %158 = tpu.concatenate %156, %157 in 0 : vector<1x8xf32>, vector<15x8xf32> -> vector<16x8xf32>
    %c560_57 = arith.constant 560 : index
    %c0_58 = arith.constant 0 : index
    %159 = vector.load %arg1[%c560_57, %c0_58] : memref<656x128xf32, #tpu.memory_space<vmem>>, vector<16x1xf32>
    %160 = vector.broadcast %159 : vector<16x1xf32> to vector<16x8xf32>
    %161 = arith.mulf %158, %160 : vector<16x8xf32>
    %162 = vector.extract_strided_slice %155 {offsets = [1, 0], sizes = [15, 8], strides = [1, 1]} : vector<16x8xf32> to vector<15x8xf32>
    %163 = vector.extract_strided_slice %155 {offsets = [0, 0], sizes = [1, 8], strides = [1, 1]} : vector<16x8xf32> to vector<1x8xf32>
    %164 = tpu.concatenate %162, %163 in 0 : vector<15x8xf32>, vector<1x8xf32> -> vector<16x8xf32>
    %c576_59 = arith.constant 576 : index
    %c0_60 = arith.constant 0 : index
    %165 = vector.load %arg1[%c576_59, %c0_60] : memref<656x128xf32, #tpu.memory_space<vmem>>, vector<16x1xf32>
    %166 = vector.broadcast %165 : vector<16x1xf32> to vector<16x8xf32>
    %167 = arith.mulf %164, %166 : vector<16x8xf32>
    %168 = tpu.concatenate %161, %155, %167 in 1 : vector<16x8xf32>, vector<16x8xf32>, vector<16x8xf32> -> vector<16x24xf32>
    %c360 = arith.constant 360 : index
    %c0_61 = arith.constant 0 : index
    %169 = vector.load %arg1[%c360, %c0_61] : memref<656x128xf32, #tpu.memory_space<vmem>>, vector<24x8xf32>
    %cst_62 = arith.constant dense<0.000000e+00> : vector<16x8xf32>
    %170 = tpu.matmul %168, %169, %cst_62 {dimension_numbers = #tpu.dot_dimension_numbers<[1], [0], [0], [1], [0, 0, 1, 1], [], []>} : vector<16x24xf32>, vector<24x8xf32>, vector<16x8xf32> -> vector<16x8xf32>
    %c384 = arith.constant 384 : index
    %c0_63 = arith.constant 0 : index
    %171 = vector.load %arg1[%c384, %c0_63] : memref<656x128xf32, #tpu.memory_space<vmem>>, vector<1x8xf32>
    %172 = vector.broadcast %171 : vector<1x8xf32> to vector<16x8xf32>
    %173 = arith.addf %170, %172 : vector<16x8xf32>
    %cst_64 = arith.constant 0.000000e+00 : f32
    %174 = vector.broadcast %cst_64 : f32 to vector<16x8xf32>
    %175 = arith.maximumf %173, %174 : vector<16x8xf32>
    %c512 = arith.constant 512 : index
    %c0_65 = arith.constant 0 : index
    %176 = vector.load %arg1[%c512, %c0_65] : memref<656x128xf32, #tpu.memory_space<vmem>>, vector<32x16xf32>
    %cst_66 = arith.constant dense<0.000000e+00> : vector<32x8xf32>
    %177 = tpu.matmul %176, %175, %cst_66 {dimension_numbers = #tpu.dot_dimension_numbers<[1], [0], [0], [1], [0, 0, 1, 1], [], []>, precision = #tpu.contract_precision<fp32>} : vector<32x16xf32>, vector<16x8xf32>, vector<32x8xf32> -> vector<32x8xf32>
    %178 = tpu.concatenate %177, %40 in 1 : vector<32x8xf32>, vector<32x8xf32> -> vector<32x16xf32>
    %179 = vector.extract_strided_slice %178 {offsets = [31, 0], sizes = [1, 16], strides = [1, 1]} : vector<32x16xf32> to vector<1x16xf32>
    %180 = vector.extract_strided_slice %178 {offsets = [0, 0], sizes = [31, 16], strides = [1, 1]} : vector<32x16xf32> to vector<31x16xf32>
    %181 = tpu.concatenate %179, %180 in 0 : vector<1x16xf32>, vector<31x16xf32> -> vector<32x16xf32>
    %c592_67 = arith.constant 592 : index
    %c0_68 = arith.constant 0 : index
    %182 = vector.load %arg1[%c592_67, %c0_68] : memref<656x128xf32, #tpu.memory_space<vmem>>, vector<32x1xf32>
    %183 = vector.broadcast %182 : vector<32x1xf32> to vector<32x16xf32>
    %184 = arith.mulf %181, %183 : vector<32x16xf32>
    %185 = vector.extract_strided_slice %178 {offsets = [1, 0], sizes = [31, 16], strides = [1, 1]} : vector<32x16xf32> to vector<31x16xf32>
    %186 = vector.extract_strided_slice %178 {offsets = [0, 0], sizes = [1, 16], strides = [1, 1]} : vector<32x16xf32> to vector<1x16xf32>
    %187 = tpu.concatenate %185, %186 in 0 : vector<31x16xf32>, vector<1x16xf32> -> vector<32x16xf32>
    %c624_69 = arith.constant 624 : index
    %c0_70 = arith.constant 0 : index
    %188 = vector.load %arg1[%c624_69, %c0_70] : memref<656x128xf32, #tpu.memory_space<vmem>>, vector<32x1xf32>
    %189 = vector.broadcast %188 : vector<32x1xf32> to vector<32x16xf32>
    %190 = arith.mulf %187, %189 : vector<32x16xf32>
    %191 = tpu.concatenate %184, %178, %190 in 1 : vector<32x16xf32>, vector<32x16xf32>, vector<32x16xf32> -> vector<32x48xf32>
    %c392 = arith.constant 392 : index
    %c0_71 = arith.constant 0 : index
    %192 = vector.load %arg1[%c392, %c0_71] : memref<656x128xf32, #tpu.memory_space<vmem>>, vector<48x4xf32>
    %cst_72 = arith.constant dense<0.000000e+00> : vector<32x4xf32>
    %193 = tpu.matmul %191, %192, %cst_72 {dimension_numbers = #tpu.dot_dimension_numbers<[1], [0], [0], [1], [0, 0, 1, 1], [], []>} : vector<32x48xf32>, vector<48x4xf32>, vector<32x4xf32> -> vector<32x4xf32>
    %c440 = arith.constant 440 : index
    %c0_73 = arith.constant 0 : index
    %194 = vector.load %arg1[%c440, %c0_73] : memref<656x128xf32, #tpu.memory_space<vmem>>, vector<1x4xf32>
    %195 = vector.broadcast %194 : vector<1x4xf32> to vector<32x4xf32>
    %196 = arith.addf %193, %195 : vector<32x4xf32>
    %cst_74 = arith.constant 0.000000e+00 : f32
    %197 = vector.broadcast %cst_74 : f32 to vector<32x4xf32>
    %198 = arith.maximumf %196, %197 : vector<32x4xf32>
    %199 = vector.extract_strided_slice %198 {offsets = [31, 0], sizes = [1, 4], strides = [1, 1]} : vector<32x4xf32> to vector<1x4xf32>
    %200 = vector.extract_strided_slice %198 {offsets = [0, 0], sizes = [31, 4], strides = [1, 1]} : vector<32x4xf32> to vector<31x4xf32>
    %201 = tpu.concatenate %199, %200 in 0 : vector<1x4xf32>, vector<31x4xf32> -> vector<32x4xf32>
    %c592_75 = arith.constant 592 : index
    %c0_76 = arith.constant 0 : index
    %202 = vector.load %arg1[%c592_75, %c0_76] : memref<656x128xf32, #tpu.memory_space<vmem>>, vector<32x1xf32>
    %203 = vector.broadcast %202 : vector<32x1xf32> to vector<32x4xf32>
    %204 = arith.mulf %201, %203 : vector<32x4xf32>
    %205 = vector.extract_strided_slice %198 {offsets = [1, 0], sizes = [31, 4], strides = [1, 1]} : vector<32x4xf32> to vector<31x4xf32>
    %206 = vector.extract_strided_slice %198 {offsets = [0, 0], sizes = [1, 4], strides = [1, 1]} : vector<32x4xf32> to vector<1x4xf32>
    %207 = tpu.concatenate %205, %206 in 0 : vector<31x4xf32>, vector<1x4xf32> -> vector<32x4xf32>
    %c624_77 = arith.constant 624 : index
    %c0_78 = arith.constant 0 : index
    %208 = vector.load %arg1[%c624_77, %c0_78] : memref<656x128xf32, #tpu.memory_space<vmem>>, vector<32x1xf32>
    %209 = vector.broadcast %208 : vector<32x1xf32> to vector<32x4xf32>
    %210 = arith.mulf %207, %209 : vector<32x4xf32>
    %211 = tpu.concatenate %204, %198, %210 in 1 : vector<32x4xf32>, vector<32x4xf32>, vector<32x4xf32> -> vector<32x12xf32>
    %c448 = arith.constant 448 : index
    %c0_79 = arith.constant 0 : index
    %212 = vector.load %arg1[%c448, %c0_79] : memref<656x128xf32, #tpu.memory_space<vmem>>, vector<12x4xf32>
    %cst_80 = arith.constant dense<0.000000e+00> : vector<32x4xf32>
    %213 = tpu.matmul %211, %212, %cst_80 {dimension_numbers = #tpu.dot_dimension_numbers<[1], [0], [0], [1], [0, 0, 1, 1], [], []>} : vector<32x12xf32>, vector<12x4xf32>, vector<32x4xf32> -> vector<32x4xf32>
    %c464 = arith.constant 464 : index
    %c0_81 = arith.constant 0 : index
    %214 = vector.load %arg1[%c464, %c0_81] : memref<656x128xf32, #tpu.memory_space<vmem>>, vector<1x4xf32>
    %215 = vector.broadcast %214 : vector<1x4xf32> to vector<32x4xf32>
    %216 = arith.addf %213, %215 : vector<32x4xf32>
    %cst_82 = arith.constant 0.000000e+00 : f32
    %217 = vector.broadcast %cst_82 : f32 to vector<32x4xf32>
    %218 = arith.maximumf %216, %217 : vector<32x4xf32>
    %c0_83 = arith.constant 0 : index
    %c0_84 = arith.constant 0 : index
    %219 = vector.load %arg2[%c0_83, %c0_84] : memref<32x4xf32, #tpu.memory_space<vmem>>, vector<32x4xf32>
    tpu.vector_store %arg2[%c0_83, %c0_84], %218 {strides = array<i32>} : memref<32x4xf32, #tpu.memory_space<vmem>>, vector<32x4xf32>,
    return
  }
}

</mosaic_0001>

<bundles_post_ra>
// kernel: tpu_custom_call.1
= control target key start
LH: loop header
LB: loop body
LE: loop exit
PB: predicated region body
PF: predicated region fallthrough
CT: control target
= control target key end

     0   :  { %7 = vsyncpa [#allocation3], 0  ;;  %s4589_s9 = smov [#allocation2]   ;;  %s5038_s0 = inlined_call_operand.vmem [shape: f32[32,4], index: 0, kind: input, shape index: {}]   ;;  %s5039_s1 = inlined_call_operand.hbm [shape: f32[656,128], index: 1, kind: input, shape index: {}]   ;;  %s5040_s2 = inlined_call_operand.vmem [shape: f32[32,4], index: 2, kind: output, shape index: {}]  }
   0x1   :  { %s15_s10 = sshll.u32 %s4589_s9, 4  ;;  %s4565_s13 = scalar_lea.hbm %s5039_s1, 10496  ;;  %s16_s10 = int_to_ptr.vmem [resolvable:$true] %s15_s10 }
   0x2   :  { %p4566_p0 = scmp.ne.s32.totalorder %s5039_s1, %s4565_s13  ;;  %p4569_p1 = scmp.lt.u32.totalorder %s4565_s13, %s5039_s1 }
   0x4   :  { %p4571_p2 = pnand %p4569_p1, %p4566_p0 }
   0x6   :  { %4574 = shalt.err (!%p4571_p2)
}
   0x7   :  { %s4575_s18 = scalar_lea.vmem %s16_s10, 10496  ;;  %p4580_p4 = scmp.lt.s32.totalorder %s16_s10, %s16_s10 }
   0x8   :  { %p4576_p3 = scmp.ne.s32.totalorder %s16_s10, %s4575_s18  ;;  %p4581_p5 = scmp.lt.s32.totalorder %s4575_s18, %s4575_s18 }
   0xa   :  { %p4582_p6 = por %p4581_p5, %p4580_p4 }
   0xc   :  { %p4583_p7 = pnand %p4582_p6, %p4576_p3 }
   0xe   :  { %4586 = shalt.err (!%p4583_p7)
}
   0xf   :  { %s4590_s19 = smov 128   ;;  %s4591_s20 = smov 8  }
  0x10   :  { %21 = dma.hbm_to_vmem [thread:$0]  %s5039_s1, 10496, %s16_s10, [#allocation3], %s4590_s19, %s4590_s19, %s4591_s20  }
  0x11   :  { %4587 = dma.done.wait [#allocation3], 10496  }
  0x12   :  { %4588 = vsyncadd [#allocation3], 4294956800  ;;  %v4592_v0 = vmov 0   ;;  %v91_v1 = vld [vmem:[#allocation2 + $0x280] sm:$0xff]  ;;  %v89_v2 = vld [vmem:[#allocation2 + $0x270] sm:$0xff]  ;;  %vm75_vm0 = vcmask 1046528  }
  0x13   :  { %4564 = vset.pattern.permute.xlu1 %v4592_v0  ;;  %4563 = vset.pattern.permute.xlu0 %v4592_v0  ;;  %v92_v3 = vld [vmem:[#allocation2 + $0x288] sm:$0xff]  ;;  %v90_v4 = vld [vmem:[#allocation2 + $0x278] sm:$0xff]  ;;  %v25_v8 = vld [vmem:[%s5038_s0] sm:$0xff]  ;;  %vm35_vm1 = vcmask 1040384   ;;  %vm175_vm2 = vcmask 1043456   ;;  %vm4594_vm3 = vmmov 1  }
  0x14   :  { %105 = vperm.xlu1 %4564, %v91_v1   ;;  %95 = vperm.xlu0 %4563, %v89_v2   ;;  %v26_v5 = vld [vmem:[%s5038_s0 + $0x8] sm:$0xff]  ;;  %v28_v9 = vld [vmem:[%s5038_s0 + $0x18] sm:$0xff]  ;;  %v36_v10 = vrot.slane %v25_v8, 7  ;;  %v76_v11 = vrot.slane %v25_v8, 1  ;;  %v27_v14 = vld [vmem:[%s5038_s0 + $0x10] sm:$0xff]  ;;  %s4593_s0 = smov 4  }
  0x15   :  { %v37_v6 = vrot.slane %v26_v5, 7  ;;  %v77_v7 = vrot.slane %v26_v5, 1  ;;  %v30_v12 = vrot.slane %v28_v9, 7  ;;  %v81_v13 = vrot.slane %v28_v9, 1  ;;  %v48_v16 = vld [vmem:[#allocation2 + $0x258] sm:$0xff]  ;;  %v47_v17 = vld [vmem:[#allocation2 + $0x250] sm:$0xff]  ;;  %vm4653_vm4 = vmpackc.low %vm175_vm2, %vm4594_vm3 }
  0x16   :  { %v79_v15 = vrot.slane %v27_v14, 1  ;;  %v39_v22 = vrot.slane %v27_v14, 7  ;;  %v50_v25 = vld [vmem:[#allocation2 + $0x268] sm:$0xff]  ;;  %v49_v26 = vld [vmem:[#allocation2 + $0x260] sm:$0xff]  ;;  %vm145_vm5 = vcmask 31744   ;;  %vm150_vm6 = vcmask 64512  }
  0x17   :  { %v78_v18 = vsel %vm75_vm0, %v76_v11, %v77_v7  ;;  %v88_v19 = vsel %vm75_vm0, %v81_v13, %v76_v11  ;;  %v38_v23 = vsel %vm35_vm1, %v36_v10, %v37_v6  ;;  %v46_v24 = vsel %vm35_vm1, %v30_v12, %v36_v10  ;;  %v155_v29 = vld [vmem:[#allocation2] sm:$0xff]  ;;  %v156_v30 = vld [vmem:[#allocation2 + $0x8] sm:$0xf]  ;;  %v343_v1 = vld [vmem:[#allocation2 + $0x18] sm:$0xff]  ;;  %s4595_s30 = smov 16   ;;  %s4596_s3 = smov 32  }
  0x18   :  { %110 = vperm.xlu1 %4564, %v92_v3   ;;  %100 = vperm.xlu0 %4563, %v90_v4   ;;  %v80_v20 = vsel %vm75_vm0, %v77_v7, %v79_v15  ;;  %v82_v21 = vsel %vm75_vm0, %v79_v15, %v81_v13  ;;  %v41_v27 = vsel %vm35_vm1, %v39_v22, %v30_v12  ;;  %vm162_vm7 = vcmask 97280   ;;  %v344_v2 = vld [vmem:[#allocation2 + $0x20] sm:$0xff]  ;;  %v3763_v4 = vld [vmem:[#allocation2 + $0x10] ss:$0 sm:$0xff]  ;;  %s4600_s4 = smov 64  }
  0x19   :  { %v40_v28 = vsel %vm35_vm1, %v37_v6, %v39_v22  ;;  %v4322_v31 = vpack.c.bf16 %v156_v30, %v155_v29  ;;  %v4328_v3 = vpack.c.bf16 %v344_v2, %v343_v1  ;;  %v345_v6 = vld [vmem:[#allocation2 + $0x28] sm:$0xff]  ;;  %vm338_vm8 = vcmask 130048  }
  0x1a   :  { %vm351_vm9 = vcmask 195584   ;;  %vm476_vm10 = vcmask 261120   ;;  %vm1213_vm11 = vcmask 392192   ;;  %vm4598_vm12 = vmmov 0  }
  0x1b   :  { %4324 = vmatprep.subr.msk.bf16.mxu0 %vm4653_vm4, %v4322_v31  ;;  %4329 = vmatprep.subr.bf16.mxu1 %v4328_v3  ;;  %vm2530_vm13 = vcmask 523264   ;;  %vm2550_vm14 = vcmask 785408  }
  0x1c   :  { %58 = vperm.xlu1 %4564, %v48_v16   ;;  %53 = vperm.xlu0 %4563, %v47_v17  }
  0x1d   :  { %4327 = vmatpush3.bf16.msk.msra.mxu0 %vm4653_vm4, %v4322_v31  ;;  %4331 = vmatpush3.bf16.msra.mxu1 %v4328_v3 }
  0x1e   :  { %3998 = vmatprep.subr.mxu1 %v345_v6 }
  0x20   :  { %68 = vperm.xlu1 %4564, %v50_v25   ;;  %63 = vperm.xlu0 %4563, %v49_v26  }
  0x21   :  { %3999 = vmatpush3.msra.mxu1 %v345_v6 }
  0x24   :  { %119 = vrot.lane.b32.xlu1 %v26_v5, %s4593_s0  ;;  %117 = vrot.lane.b32.xlu0 %v25_v8, %s4593_s0 }
  0x28   :  { %123 = vrot.lane.b32.xlu1 %v28_v9, %s4593_s0  ;;  %121 = vrot.lane.b32.xlu0 %v27_v14, %s4593_s0 }
  0x93   :  { %v4661_v33 = vpop.permute.xlu1 %105  ;;  %v4663_v34 = vpop.permute.xlu0 %95 }
  0x94   :  { %v113_v35 = vmul.f32 %v4663_v34, %v78_v18  ;;  %v115_v36 = vmul.f32 %v4661_v33, %v82_v21 }
  0x96   :  { %133 = vrot.lane.b32.xlu0 %v113_v35, %s4591_s20 }
  0x97   :  { %v4668_v37 = vpop.permute.xlu0 %100  ;;  %v4671_v39 = vpop.permute.xlu1 %110 }
  0x98   :  { %v114_v38 = vmul.f32 %v4668_v37, %v80_v20  ;;  %v116_v40 = vmul.f32 %v4671_v39, %v88_v19 }
  0x9a   :  { %135 = vrot.lane.b32.xlu1 %v114_v38, %s4591_s20  ;;  %137 = vrot.lane.b32.xlu0 %v115_v36, %s4591_s20 }
  0x9b   :  { %v4677_v41 = vpop.permute.xlu0 %53  ;;  %v4679_v42 = vpop.permute.xlu1 %58 }
  0x9c   :  { %v71_v48 = vmul.f32 %v4677_v41, %v46_v24  ;;  %v72_v53 = vmul.f32 %v4679_v42, %v38_v23 }
  0x9e   :  { %139 = vrot.lane.b32.xlu1 %v116_v40, %s4591_s20 }
  0x9f   :  { %v4681_v43 = vpop.permute.xlu0 %63  ;;  %v4683_v44 = vpop.permute.xlu1 %68 }
  0xa0   :  { %v73_v54 = vmul.f32 %v4681_v43, %v40_v28  ;;  %v74_v61 = vmul.f32 %v4683_v44, %v41_v27 }
  0xa3   :  { %v118_v45 = vpop.permute.xlu0 %117  ;;  %v120_v46 = vpop.permute.xlu1 %119 }
  0xa4   :  { %v146_v49 = vsel %vm145_vm5, %v71_v48, %v118_v45  ;;  %v147_v55 = vsel %vm145_vm5, %v72_v53, %v120_v46  ;;  %v1042_v48 = vld [vmem:[#allocation2 + $0x248] sm:$0xff] }
  0xa7   :  { %v122_v47 = vpop.permute.xlu0 %121  ;;  %v124_v50 = vpop.permute.xlu1 %123 }
  0xa8   :  { %v148_v56 = vsel %vm145_vm5, %v73_v54, %v122_v47  ;;  %v149_v62 = vsel %vm145_vm5, %v74_v61, %v124_v50  ;;  %v1041_v47 = vld [vmem:[#allocation2 + $0x240] sm:$0xff]  ;;  %v1021_v50 = vld [vmem:[#allocation2 + $0x238] sm:$0xff] }
 0x108   :  { %v134_v51 = vpop.permute.xlu0 %133 }
 0x109   :  { %v151_v52 = vsel %vm150_vm6, %v146_v49, %v134_v51  ;;  %v1020_v49 = vld [vmem:[#allocation2 + $0x230] sm:$0xff] }
 0x10a   :  { %3988 = vmatprep.mubr.msk.f32.mxu0 %vm162_vm7, %v151_v52 }
 0x10c   :  { %v136_v57 = vpop.permute.xlu1 %135  ;;  %v138_v58 = vpop.permute.xlu0 %137 }
 0x10d   :  { %v152_v59 = vsel %vm150_vm6, %v147_v55, %v136_v57  ;;  %v153_v60 = vsel %vm150_vm6, %v148_v56, %v138_v58 }
 0x10e   :  { %3989 = vmatmul.mubr.msk.f32.vlgmr.msra.gmra.mrb[0].mxu0 %vm162_vm7, %v152_v59 }
 0x10f   :  { %3991 = vmatprep.mubr.msk.f32.mxu0 %vm162_vm7, %v153_v60 }
 0x110   :  { %v140_v63 = vpop.permute.xlu1 %139 }
 0x111   :  { %v154_v0 = vsel %vm150_vm6, %v149_v62, %v140_v63 }
 0x112   :  { %3992 = vmatmul.mubr.msk.f32.gmra.mrb[2].mxu0 %vm162_vm7, %v154_v0 }
 0x1e1   :  { %v3990_v5 = vpop.f32.mrb[0].mxu0 }
 0x1e2   :  { %v251_v7 = vadd.f32 %v3990_v5, %v3763_v4  ;;  %v245_v8 = vpop.f32.mrb[1].mxu0 }
 0x1e3   :  { %v246_v9 = vadd.f32 %v3763_v4, %v245_v8 }
 0x1e4   :  { %v265_v10 = vmax.f32 %v251_v7, 0.0  ;;  %v474_v7 = vld [vmem:[#allocation2 + $0x1d8] sm:$0xff] }
 0x1e5   :  { %v264_v11 = vmax.f32 %v246_v9, 0.0  ;;  %v3993_v12 = vpop.f32.mrb[2].mxu0  ;;  %v478_v8 = vsel %vm476_vm10, %v474_v7, 0 }
 0x1e6   :  { %v275_v13 = vrot.slane %v265_v10, 7  ;;  %v290_v14 = vrot.slane %v265_v10, 1  ;;  %v261_v15 = vadd.f32 %v3993_v12, %v3763_v4  ;;  %308 = vrot.lane.b32.xlu1 %v265_v10, %s4591_s20  ;;  %v255_v16 = vpop.f32.mrb[3].mxu0  ;;  %v4738_v9 = vand.u32 4294901760, %v478_v8 }
 0x1e7   :  { %v274_v17 = vrot.slane %v264_v11, 7  ;;  %v289_v18 = vrot.slane %v264_v11, 1  ;;  %v256_v19 = vadd.f32 %v3763_v4, %v255_v16  ;;  %306 = vrot.lane.b32.xlu0 %v264_v11, %s4591_s20 }
 0x1e8   :  { %v267_v20 = vmax.f32 %v261_v15, 0.0  ;;  %4025 = vmatprep.mubr.f32.mxu0 %v4738_v9  ;;  %v4742_v10 = vsub.f32 %v478_v8, %v4738_v9 }
 0x1e9   :  { %v266_v21 = vmax.f32 %v256_v19, 0.0  ;;  %v291_v22 = vsel %vm75_vm0, %v289_v18, %v290_v14  ;;  %v276_v23 = vsel %vm35_vm1, %v274_v17, %v275_v13 }
 0x1ea   :  { %v269_v24 = vrot.slane %v267_v20, 7  ;;  %v294_v25 = vrot.slane %v267_v20, 1  ;;  %312 = vrot.lane.b32.xlu1 %v267_v20, %s4591_s20  ;;  %v302_v30 = vmul.f32 %v291_v22, %v4663_v34  ;;  %v286_v56 = vmul.f32 %v276_v23, %v4679_v42 }
 0x1eb   :  { %v277_v26 = vrot.slane %v266_v21, 7  ;;  %v292_v27 = vrot.slane %v266_v21, 1  ;;  %310 = vrot.lane.b32.xlu0 %v266_v21, %s4591_s20  ;;  %v554_v11 = vand.u32 4294901760, %v4742_v10 }
 0x1ec   :  { %v301_v28 = vsel %vm75_vm0, %v294_v25, %v289_v18  ;;  %v284_v29 = vsel %vm35_vm1, %v269_v24, %v274_v17 }
 0x1ed   :  { %v293_v31 = vsel %vm75_vm0, %v290_v14, %v292_v27  ;;  %v295_v35 = vsel %vm75_vm0, %v292_v27, %v294_v25  ;;  %v279_v38 = vsel %vm35_vm1, %v277_v26, %v269_v24  ;;  %v278_v40 = vsel %vm35_vm1, %v275_v13, %v277_v26  ;;  %v3769_v14 = vld [vmem:[#allocation2 + $0x30] ss:$0 sm:$0xff] }
 0x1ee   :  { %v303_v36 = vmul.f32 %v293_v31, %v4668_v37  ;;  %v304_v45 = vmul.f32 %v295_v35, %v4661_v33  ;;  %v305_v46 = vmul.f32 %v301_v28, %v4671_v39  ;;  %v285_v55 = vmul.f32 %v284_v29, %v4677_v41  ;;  %v475_v28 = vld [vmem:[#allocation2 + $0x1e0] sm:$0xff] }
 0x1ef   :  { %322 = vrot.lane.b32.xlu0 %v302_v30, %s4595_s30  ;;  %v287_v62 = vmul.f32 %v278_v40, %v4681_v43  ;;  %v288_v0 = vmul.f32 %v279_v38, %v4683_v44  ;;  %v555_v12 = vsub.f32 %v4742_v10, %v554_v11  ;;  %v481_v38 = vsel %vm476_vm10, %v475_v28, 0  ;;  %v1075_v28 = vld [vmem:[#allocation2 + $0x48] sm:$0xff] }
 0x1f0   :  { %324 = vrot.lane.b32.xlu1 %v303_v36, %s4595_s30 }
 0x1f1   :  { %v556_v13 = vand.u32 4294901760, %v555_v12 }
 0x1f3   :  { %326 = vrot.lane.b32.xlu0 %v304_v45, %s4595_s30 }
 0x1f4   :  { %328 = vrot.lane.b32.xlu1 %v305_v46, %s4595_s30 }
 0x1f7   :  { %1045 = vperm.xlu0 %4563, %v1041_v47  }
 0x1f8   :  { %1050 = vperm.xlu1 %4564, %v1042_v48  }
 0x1fb   :  { %1024 = vperm.xlu0 %4563, %v1020_v49  }
 0x1fc   :  { %1029 = vperm.xlu1 %4564, %v1021_v50  }
 0x258   :  { %v309_v51 = vpop.permute.xlu1 %308 }
 0x259   :  { %v307_v52 = vpop.permute.xlu0 %306  ;;  %v335_v59 = vsel %vm150_vm6, %v286_v56, %v309_v51 }
 0x25a   :  { %v334_v57 = vsel %vm150_vm6, %v285_v55, %v307_v52  ;;  %v4769_v52 = vand.u32 4294901760, %v481_v38 }
 0x25c   :  { %v313_v54 = vpop.permute.xlu1 %312  ;;  %v563_v56 = vsub.f32 %v481_v38, %v4769_v52 }
 0x25d   :  { %v311_v53 = vpop.permute.xlu0 %310  ;;  %v337_v3 = vsel %vm150_vm6, %v288_v0, %v313_v54 }
 0x25e   :  { %v336_v1 = vsel %vm150_vm6, %v287_v62, %v311_v53 }
 0x261   :  { %v323_v58 = vpop.permute.xlu0 %322 }
 0x262   :  { %v325_v60 = vpop.permute.xlu1 %324  ;;  %v339_v61 = vsel %vm338_vm8, %v334_v57, %v323_v58 }
 0x263   :  { %v340_v63 = vsel %vm338_vm8, %v335_v59, %v325_v60  ;;  %4000 = vmatprep.mubr.msk.f32.mxu1 %vm351_vm9, %v339_v61  ;;  %v564_v61 = vand.u32 4294901760, %v563_v56 }
 0x264   :  { %4001 = vmatmul.mubr.msk.f32.vlgmr.msra.gmra.mrb[0].mxu1 %vm351_vm9, %v340_v63 }
 0x265   :  { %v327_v2 = vpop.permute.xlu0 %326 }
 0x266   :  { %v341_v4 = vsel %vm338_vm8, %v336_v1, %v327_v2  ;;  %v329_v5 = vpop.permute.xlu1 %328  ;;  %v565_v2 = vsub.f32 %v563_v56, %v564_v61 }
 0x267   :  { %v342_v6 = vsel %vm338_vm8, %v337_v3, %v329_v5  ;;  %4003 = vmatprep.mubr.msk.f32.mxu1 %vm351_vm9, %v341_v4 }
 0x268   :  { %4004 = vmatmul.mubr.msk.f32.gmra.mrb[2].mxu1 %vm351_vm9, %v342_v6  ;;  %v566_v8 = vand.u32 4294901760, %v565_v2  ;;  %v1202_v2 = vld [vmem:[#allocation2 + $0x58] sm:$0xff] }
 0x269   :  { %4014 = vmatprep.mubr.f32.mxu1 %v556_v13 }
 0x337   :  { %v4002_v15 = vpop.f32.mrb[0].mxu1 }
 0x338   :  { %v436_v16 = vadd.f32 %v4002_v15, %v3769_v14  ;;  %v430_v17 = vpop.f32.mrb[1].mxu1 }
 0x339   :  { %v431_v18 = vadd.f32 %v3769_v14, %v430_v17 }
 0x33a   :  { %v4748_v19 = vmax.f32 %v436_v16, 0.0 }
 0x33b   :  { %v4750_v20 = vmax.f32 %v431_v18, 0.0  ;;  %v4005_v21 = vpop.f32.mrb[2].mxu1 }
 0x33c   :  { %v458_v22 = vrot.slane %v4748_v19, 1  ;;  %v446_v23 = vadd.f32 %v4005_v21, %v3769_v14  ;;  %v440_v24 = vpop.f32.mrb[3].mxu1 }
 0x33d   :  { %v457_v25 = vrot.slane %v4750_v20, 1  ;;  %v441_v26 = vadd.f32 %v3769_v14, %v440_v24  ;;  %v1073_v24 = vld [vmem:[#allocation2 + $0x38] sm:$0xff] }
 0x33e   :  { %v4754_v27 = vmax.f32 %v446_v23, 0.0 }
 0x33f   :  { %v459_v29 = vsel %vm75_vm0, %v457_v25, %v458_v22  ;;  %v4757_v30 = vmax.f32 %v441_v26, 0.0 }
 0x340   :  { %v470_v31 = vmax.f32 %v4750_v20, %v459_v29  ;;  %v462_v35 = vrot.slane %v4754_v27, 1 }
 0x341   :  { %v460_v36 = vrot.slane %v4757_v30, 1 }
 0x342   :  { %v484_v40 = vand.u32 4294901760, %v470_v31  ;;  %v469_v45 = vsel %vm75_vm0, %v462_v35, %v457_v25  ;;  %v1074_v25 = vld [vmem:[#allocation2 + $0x40] sm:$0xff] }
 0x343   :  { %v473_v46 = vmax.f32 %v4754_v27, %v469_v45  ;;  %v461_v47 = vsel %vm75_vm0, %v458_v22, %v460_v36  ;;  %v463_v48 = vsel %vm75_vm0, %v460_v36, %v462_v35  ;;  %v4380_v26 = vpack.c.bf16 %v1074_v25, %v1073_v24 }
 0x344   :  { %v574_v49 = vsub.f32 %v470_v31, %v484_v40  ;;  %v471_v50 = vmax.f32 %v4748_v19, %v461_v47  ;;  %v472_v51 = vmax.f32 %v4757_v30, %v463_v48  ;;  %v4784_v47 = vpop.permute.xlu1 %1050 }
 0x345   :  { %v493_v53 = vand.u32 4294901760, %v473_v46 }
 0x346   :  { %v487_v54 = vand.u32 4294901760, %v471_v50  ;;  %v490_v55 = vand.u32 4294901760, %v472_v51  ;;  %v575_v58 = vand.u32 4294901760, %v574_v49 }
 0x347   :  { %v595_v57 = vsub.f32 %v473_v46, %v493_v53  ;;  %v4782_v46 = vpop.permute.xlu0 %1045 }
 0x348   :  { %v4332_v59 = vpack.c.bf16 %v487_v54, %v484_v40  ;;  %v588_v60 = vsub.f32 %v472_v51, %v490_v55  ;;  %v581_v62 = vsub.f32 %v471_v50, %v487_v54  ;;  %v4336_v0 = vpack.c.bf16 %v493_v53, %v490_v55  ;;  %v4796_v55 = vpop.permute.xlu1 %1029 }
 0x349   :  { %v596_v63 = vand.u32 4294901760, %v595_v57  ;;  %v576_v3 = vsub.f32 %v574_v49, %v575_v58 }
 0x34a   :  { %4333 = vmatprep.subr.bf16.mxu1 %v4332_v59  ;;  %v589_v1 = vand.u32 4294901760, %v588_v60  ;;  %v582_v4 = vand.u32 4294901760, %v581_v62  ;;  %v4348_v18 = vpack.c.bf16 %v581_v62, %v574_v49  ;;  %v4352_v21 = vpack.c.bf16 %v595_v57, %v588_v60 }
 0x34b   :  { %4335 = vmatpush3.bf16.msra.mxu1 %v4332_v59  ;;  %v597_v5 = vsub.f32 %v595_v57, %v596_v63  ;;  %v577_v12 = vand.u32 4294901760, %v576_v3  ;;  %v4794_v54 = vpop.permute.xlu0 %1024  ;;  %v1203_v3 = vld [vmem:[#allocation2 + $0x60] sm:$0xff] }
 0x34c   :  { %4337 = vmatprep.subr.bf16.mxu1 %v4336_v0  ;;  %v590_v6 = vsub.f32 %v588_v60, %v589_v1  ;;  %v583_v7 = vsub.f32 %v581_v62, %v582_v4  ;;  %v4364_v22 = vpack.c.bf16 %v582_v4, %v575_v58  ;;  %v4368_v23 = vpack.c.bf16 %v596_v63, %v589_v1 }
 0x34d   :  { %v598_v15 = vand.u32 4294901760, %v597_v5  ;;  %v4384_v4 = vpack.c.bf16 %v1203_v3, %v1202_v2  ;;  %v1204_v5 = vld [vmem:[#allocation2 + $0x68] sm:$0xff] }
 0x34e   :  { %v584_v13 = vand.u32 4294901760, %v583_v7  ;;  %v591_v14 = vand.u32 4294901760, %v590_v6  ;;  %v1205_v6 = vld [vmem:[#allocation2 + $0x70] sm:$0xff] }
 0x34f   :  { %4339 = vmatpush3.bf16.msra.mxu1 %v4336_v0  ;;  %v4388_v7 = vpack.c.bf16 %v1205_v6, %v1204_v5 }
 0x350   :  { %v4340_v16 = vpack.c.bf16 %v584_v13, %v577_v12  ;;  %v4344_v17 = vpack.c.bf16 %v598_v15, %v591_v14  ;;  %4381 = vmatprep.subr.bf16.mxu1 %v4380_v26  ;;  %v1207_v12 = vld [vmem:[#allocation2 + $0x80] sm:$0xff]  ;;  %v3774_v14 = vld [vmem:[#allocation2 + $0x50] ss:$0 sm:$0xff] }
 0x352   :  { %4015 = vmatmul.mubr.f32.vlgmr.msra.gmra.mrb[4].mxu1 %v566_v8  ;;  %4341 = vmatprep.subr.bf16.mxu0 %v4340_v16  ;;  %v1206_v8 = vld [vmem:[#allocation2 + $0x78] sm:$0xff] }
 0x353   :  { %4343 = vmatpush3.bf16.msra.mxu0 %v4340_v16  ;;  %4383 = vmatpush3.bf16.msra.mxu1 %v4380_v26  ;;  %v4392_v13 = vpack.c.bf16 %v1207_v12, %v1206_v8 }
 0x354   :  { %4345 = vmatprep.subr.bf16.mxu0 %v4344_v17  ;;  %4076 = vmatprep.subr.mxu1 %v1075_v28 }
 0x357   :  { %4347 = vmatpush3.bf16.msra.mxu0 %v4344_v17  ;;  %4077 = vmatpush3.msra.mxu1 %v1075_v28 }
 0x358   :  { %4349 = vmatprep.subr.bf16.mxu0 %v4348_v18  ;;  %4385 = vmatprep.subr.bf16.mxu1 %v4384_v4 }
 0x35a   :  { %4026 = vmatmul.mubr.f32.vlgmr.msra.gmra.mrb[4].mxu0 %v4769_v52 }
 0x35b   :  { %4351 = vmatpush3.bf16.msra.mxu0 %v4348_v18  ;;  %4036 = vmatprep.mubr.f32.mxu0 %v4742_v10 }
 0x35c   :  { %4353 = vmatprep.subr.bf16.mxu0 %v4352_v21 }
 0x35f   :  { %4355 = vmatpush3.bf16.msra.mxu0 %v4352_v21 }
 0x360   :  { %4357 = vmatprep.subr.bf16.mxu0 %v4332_v59 }
 0x362   :  { %4037 = vmatmul.mubr.f32.vlgmr.msra.gmra.mrb[4].mxu0 %v563_v56 }
 0x363   :  { %4359 = vmatpush3.bf16.msra.mxu0 %v4332_v59  ;;  %4047 = vmatprep.mubr.f32.mxu0 %v554_v11 }
 0x364   :  { %4361 = vmatprep.subr.bf16.mxu0 %v4336_v0 }
 0x367   :  { %4363 = vmatpush3.bf16.msra.mxu0 %v4336_v0 }
 0x368   :  { %4365 = vmatprep.subr.bf16.mxu0 %v4364_v22 }
 0x36a   :  { %4048 = vmatmul.mubr.f32.vlgmr.msra.gmra.mrb[4].mxu0 %v564_v61 }
 0x36b   :  { %4367 = vmatpush3.bf16.msra.mxu0 %v4364_v22  ;;  %4058 = vmatprep.mubr.f32.mxu0 %v4738_v9 }
 0x36c   :  { %4369 = vmatprep.subr.bf16.mxu0 %v4368_v23 }
 0x36f   :  { %4371 = vmatpush3.bf16.msra.mxu0 %v4368_v23 }
 0x370   :  { %4373 = vmatprep.subr.bf16.mxu0 %v4332_v59 }
 0x372   :  { %4059 = vmatmul.mubr.f32.vlgmr.msra.gmra.mrb[4].mxu0 %v4769_v52 }
 0x373   :  { %4375 = vmatpush3.bf16.msra.mxu0 %v4332_v59  ;;  %4069 = vmatprep.mubr.f32.mxu0 %v4738_v9 }
 0x374   :  { %4377 = vmatprep.subr.bf16.mxu0 %v4336_v0 }
 0x377   :  { %4379 = vmatpush3.bf16.msra.mxu0 %v4336_v0 }
 0x37a   :  { %4070 = vmatmul.mubr.f32.vlgmr.msra.gmra.mrb[4].mxu0 %v4769_v52 }
 0x425   :  { %v4016_v10 = vpop.f32.mrb[4].mxu1 }
 0x426   :  { %v558_v11 = vpop.f32.mrb[5].mxu1 }
 0x44d   :  { %v4071_v29 = vpop.f32.mrb[4].mxu0 }
 0x44e   :  { %v4502_v31 = vadd.f32 %v4071_v29, %v4016_v10  ;;  %v1001_v35 = vpop.f32.mrb[5].mxu0 }
 0x44f   :  { %v4503_v36 = vadd.f32 %v1001_v35, %v558_v11 }
 0x450   :  { %v1012_v38 = vrot.slane %v4502_v31, 7  ;;  %v1035_v9 = vrot.slane %v4502_v31, 1  ;;  %1057 = vrot.lane.b32.xlu1 %v4502_v31, %s4591_s20 }
 0x451   :  { %v1015_v40 = vrot.slane %v4503_v36, 7  ;;  %v1034_v45 = vrot.slane %v4503_v36, 1  ;;  %1055 = vrot.lane.b32.xlu0 %v4503_v36, %s4591_s20  ;;  %v1775_v36 = vld [vmem:[#allocation2 + $0x220] sm:$0xff] }
 0x453   :  { %v1040_v48 = vsel %vm75_vm0, %v1035_v9, %v1034_v45  ;;  %v1036_v49 = vsel %vm75_vm0, %v1034_v45, %v1035_v9  ;;  %v1016_v50 = vsel %vm35_vm1, %v1015_v40, %v1012_v38  ;;  %v1019_v51 = vsel %vm35_vm1, %v1012_v38, %v1015_v40  ;;  %v1785_v38 = vld [vmem:[#allocation2 + $0x228] sm:$0xff] }
 0x454   :  { %v1054_v52 = vmul.f32 %v4784_v47, %v1040_v48  ;;  %v1053_v53 = vmul.f32 %v4782_v46, %v1036_v49  ;;  %v1033_v58 = vmul.f32 %v4796_v55, %v1016_v50  ;;  %v1032_v59 = vmul.f32 %v4794_v54, %v1019_v51 }
 0x456   :  { %1065 = vrot.lane.b32.xlu1 %v1054_v52, %s4595_s30  ;;  %1063 = vrot.lane.b32.xlu0 %v1053_v53, %s4595_s30 }
 0x4c2   :  { %v1058_v57 = vpop.permute.xlu1 %1057 }
 0x4c3   :  { %v1056_v56 = vpop.permute.xlu0 %1055  ;;  %v1070_v60 = vsel %vm150_vm6, %v1033_v58, %v1058_v57  ;;  %v4597_v57 = vmov 0.0|0.0   ;;  %v4599_v58 = vmov 0.0  }
 0x4c4   :  { %v1069_v61 = vsel %vm150_vm6, %v1032_v59, %v1056_v56  ;;  %4396 = vmatprep.subr.bf16.mxu0 %v4597_v57  ;;  %4100 = vmatprep.mubr.msk.f32.mxu0 %vm4598_vm12, %v4599_v58  ;;  %v3777_v59 = vld [vmem:[#allocation2 + $0x88] ss:$0 sm:$0xff] }
 0x4c8   :  { %v1066_v62 = vpop.permute.xlu1 %1065  ;;  %v1064_v63 = vpop.permute.xlu0 %1063 }
 0x4c9   :  { %v1072_v0 = vsel %vm338_vm8, %v1070_v60, %v1066_v62  ;;  %v1071_v1 = vsel %vm338_vm8, %v1069_v61, %v1064_v63  ;;  %v1308_v60 = vld [vmem:[#allocation2 + $0x1e8] sm:$0xff] }
 0x4ca   :  { %4078 = vmatprep.mubr.msk.f32.mxu1 %vm351_vm9, %v1071_v1 }
 0x4cb   :  { %4079 = vmatmul.mubr.msk.f32.vlgmr.msra.gmra.mrb[6].mxu1 %vm351_vm9, %v1072_v0  ;;  %v1310_v0 = vsel %vm338_vm8, %v1308_v60, 0 }
 0x4cc   :  { %4387 = vmatpush3.bf16.msra.mxu1 %v4384_v4  ;;  %v1379_v4 = vand.u32 4294901760, %v1310_v0 }
 0x4cd   :  { %4389 = vmatprep.subr.bf16.mxu1 %v4388_v7 }
 0x4d0   :  { %4391 = vmatpush3.bf16.msra.mxu1 %v4388_v7  ;;  %v1380_v7 = vsub.f32 %v1310_v0, %v1379_v4 }
 0x4d1   :  { %4393 = vmatprep.subr.bf16.mxu1 %v4392_v13 }
 0x4d4   :  { %4395 = vmatpush3.bf16.msra.mxu1 %v4392_v13  ;;  %v1381_v13 = vand.u32 4294901760, %v1380_v7 }
 0x4d5   :  { %4399 = vmatprep.subr.bf16.mxu1 %v4597_v57 }
 0x59e   :  { %v4080_v15 = vpop.f32.mrb[6].mxu1 }
 0x59f   :  { %v1159_v16 = vadd.f32 %v4080_v15, %v3774_v14  ;;  %v1153_v17 = vpop.f32.mrb[7].mxu1 }
 0x5a0   :  { %v1154_v18 = vadd.f32 %v3774_v14, %v1153_v17 }
 0x5a1   :  { %v1163_v21 = vmax.f32 %v1159_v16, 0.0  ;;  %v1382_v16 = vsub.f32 %v1380_v7, %v1381_v13 }
 0x5a2   :  { %v1162_v22 = vmax.f32 %v1154_v18, 0.0 }
 0x5a3   :  { %v1165_v23 = vrot.slane %v1163_v21, 7  ;;  %v1176_v10 = vrot.slane %v1163_v21, 1  ;;  %1186 = vrot.lane.b32.xlu1 %v1163_v21, %s4595_s30 }
 0x5a4   :  { %v1168_v11 = vrot.slane %v1162_v22, 7  ;;  %v1175_v24 = vrot.slane %v1162_v22, 1  ;;  %1184 = vrot.lane.b32.xlu0 %v1162_v22, %s4595_s30 }
 0x5a6   :  { %v1181_v25 = vsel %vm75_vm0, %v1176_v10, %v1175_v24  ;;  %v1177_v26 = vsel %vm75_vm0, %v1175_v24, %v1176_v10  ;;  %v1169_v28 = vsel %vm35_vm1, %v1168_v11, %v1165_v23  ;;  %v1172_v29 = vsel %vm35_vm1, %v1165_v23, %v1168_v11 }
 0x5a7   :  { %v1183_v31 = vmul.f32 %v1181_v25, %v4784_v47  ;;  %v1182_v35 = vmul.f32 %v1177_v26, %v4782_v46  ;;  %v1174_v45 = vmul.f32 %v1169_v28, %v4796_v55  ;;  %v1173_v48 = vmul.f32 %v1172_v29, %v4794_v54 }
 0x5a8   :  { %v1383_v10 = vand.u32 4294901760, %v1382_v16  ;;  %v1907_v16 = vld [vmem:[#allocation2 + $0xe0] sm:$0xff] }
 0x5a9   :  { %1194 = vrot.lane.b32.xlu1 %v1183_v31, %s4596_s3  ;;  %1192 = vrot.lane.b32.xlu0 %v1182_v35, %s4596_s3 }
 0x5ad   :  { %1778 = vperm.xlu1 %4564, %v1775_v36   ;;  %1788 = vperm.xlu0 %4563, %v1785_v38   ;;  %v1801_v38 = vld [vmem:[#allocation2 + $0x90] sm:$0xff] }
 0x615   :  { %v1187_v40 = vpop.permute.xlu1 %1186 }
 0x616   :  { %v1185_v9 = vpop.permute.xlu0 %1184  ;;  %v1199_v49 = vsel %vm338_vm8, %v1174_v45, %v1187_v40  ;;  %v1803_v40 = vld [vmem:[#allocation2 + $0xa0] sm:$0xff] }
 0x617   :  { %v1198_v50 = vsel %vm338_vm8, %v1173_v48, %v1185_v9  ;;  %v1802_v9 = vld [vmem:[#allocation2 + $0x98] sm:$0xff]  ;;  %v1804_v48 = vld [vmem:[#allocation2 + $0xa8] sm:$0xff] }
 0x618   :  { %v4415_v45 = vpack.c.bf16 %v1802_v9, %v1801_v38  ;;  %v1989_v9 = vld [vmem:[#allocation2 + $0x1f0] sm:$0xff] }
 0x61b   :  { %v1195_v51 = vpop.permute.xlu1 %1194  ;;  %v1193_v52 = vpop.permute.xlu0 %1192 }
 0x61c   :  { %v1201_v53 = vsel %vm476_vm10, %v1199_v49, %v1195_v51  ;;  %v1200_v56 = vsel %vm476_vm10, %v1198_v50, %v1193_v52  ;;  %v4418_v49 = vpack.c.bf16 %v1804_v48, %v1803_v40  ;;  %v1805_v52 = vld [vmem:[#allocation2 + $0xb0] sm:$0xff]  ;;  %v1992_v40 = vsel %vm150_vm6, %v1989_v9, 0 }
 0x61d   :  { %4093 = vmatprep.mubr.msk.f32.mxu1 %vm1213_vm11, %v1200_v56 }
 0x61e   :  { %4094 = vmatmul.mubr.msk.f32.vlgmr.msra.gmra.mrb[8].mxu1 %vm1213_vm11, %v1201_v53  ;;  %v1806_v53 = vld [vmem:[#allocation2 + $0xb8] sm:$0xff] }
 0x61f   :  { %4107 = vmatprep.mubr.msk.f32.mxu1 %vm4598_vm12, %v4599_v58  ;;  %v4421_v56 = vpack.c.bf16 %v1806_v53, %v1805_v52 }
 0x6f1   :  { %v4095_v61 = vpop.f32.mrb[8].mxu1 }
 0x6f2   :  { %v1292_v62 = vadd.f32 %v4095_v61, %v3777_v59  ;;  %v1286_v63 = vpop.f32.mrb[9].mxu1 }
 0x6f3   :  { %v1287_v1 = vadd.f32 %v3777_v59, %v1286_v63 }
 0x6f4   :  { %v4829_v2 = vmax.f32 %v1292_v62, 0.0  ;;  %v1789_v62 = vpop.permute.xlu0 %1788 }
 0x6f5   :  { %v4831_v3 = vmax.f32 %v1287_v1, 0.0  ;;  %v1779_v1 = vpop.permute.xlu1 %1778 }
 0x6f6   :  { %v1300_v5 = vrot.slane %v4829_v2, 1 }
 0x6f7   :  { %v1299_v6 = vrot.slane %v4831_v3, 1 }
 0x6f9   :  { %v1301_v8 = vsel %vm75_vm0, %v1299_v6, %v1300_v5  ;;  %v1305_v12 = vsel %vm75_vm0, %v1300_v5, %v1299_v6 }
 0x6fa   :  { %v1306_v14 = vmax.f32 %v4831_v3, %v1301_v8  ;;  %v1307_v15 = vmax.f32 %v4829_v2, %v1305_v12  ;;  %v1904_v12 = vld [vmem:[#allocation2 + $0xc8] sm:$0xff] }
 0x6fc   :  { %v1313_v17 = vand.u32 4294901760, %v1306_v14  ;;  %v1316_v18 = vand.u32 4294901760, %v1307_v15 }
 0x6fe   :  { %v1391_v21 = vsub.f32 %v1306_v14, %v1313_v17  ;;  %v4397_v22 = vpack.c.bf16 %v1316_v18, %v1313_v17  ;;  %v1398_v23 = vsub.f32 %v1307_v15, %v1316_v18  ;;  %v1906_v14 = vld [vmem:[#allocation2 + $0xd8] sm:$0xff]  ;;  %v1908_v18 = vld [vmem:[#allocation2 + $0xe8] sm:$0xff] }
 0x6ff   :  { %v4427_v17 = vpack.c.bf16 %v1907_v16, %v1906_v14 }
 0x700   :  { %4398 = vmatpush3.bf16.msra.mxu0 %v4397_v22  ;;  %v1392_v11 = vand.u32 4294901760, %v1391_v21  ;;  %v1399_v24 = vand.u32 4294901760, %v1398_v23  ;;  %v4403_v35 = vpack.c.bf16 %v1398_v23, %v1391_v21 }
 0x701   :  { %4423 = vmatprep.subr.bf16.mxu0 %v4597_v57 }
 0x702   :  { %v1393_v25 = vsub.f32 %v1391_v21, %v1392_v11  ;;  %v1400_v26 = vsub.f32 %v1398_v23, %v1399_v24  ;;  %v4409_v36 = vpack.c.bf16 %v1399_v24, %v1392_v11  ;;  %v1909_v21 = vld [vmem:[#allocation2 + $0xf0] sm:$0xff]  ;;  %v3780_v23 = vld [vmem:[#allocation2 + $0xc0] ss:$0 sm:$0xff] }
 0x703   :  { %4101 = vmatmul.mubr.f32.vlgmr.msra.gmra.mrb[6].mxu0 %v1383_v10 }
 0x704   :  { %v1394_v28 = vand.u32 4294901760, %v1393_v25  ;;  %v1401_v29 = vand.u32 4294901760, %v1400_v26  ;;  %4165 = vmatprep.mubr.msk.f32.mxu0 %vm4598_vm12, %v4599_v58 }
 0x706   :  { %v4400_v31 = vpack.c.bf16 %v1401_v29, %v1394_v28 }
 0x708   :  { %4401 = vmatpush3.bf16.msra.mxu1 %v4400_v31 }
 0x709   :  { %4402 = vmatprep.subr.bf16.mxu1 %v4597_v57 }
 0x70b   :  { %4108 = vmatmul.mubr.f32.vlgmr.msra.gmra.mrb[10].mxu1 %v1379_v4 }
 0x70c   :  { %4404 = vmatpush3.bf16.msra.mxu1 %v4403_v35  ;;  %4114 = vmatprep.mubr.msk.f32.mxu1 %vm4598_vm12, %v4599_v58 }
 0x70d   :  { %4405 = vmatprep.subr.bf16.mxu1 %v4597_v57 }
 0x713   :  { %4115 = vmatmul.mubr.f32.vlgmr.msra.gmra.mrb[10].mxu1 %v1380_v7 }
 0x714   :  { %4407 = vmatpush3.bf16.msra.mxu1 %v4397_v22  ;;  %4121 = vmatprep.mubr.msk.f32.mxu1 %vm4598_vm12, %v4599_v58 }
 0x715   :  { %4408 = vmatprep.subr.bf16.mxu1 %v4597_v57 }
 0x71b   :  { %4122 = vmatmul.mubr.f32.vlgmr.msra.gmra.mrb[10].mxu1 %v1381_v13  ;;  %v1905_v13 = vld [vmem:[#allocation2 + $0xd0] sm:$0xff] }
 0x71c   :  { %4410 = vmatpush3.bf16.msra.mxu1 %v4409_v36  ;;  %4128 = vmatprep.mubr.msk.f32.mxu1 %vm4598_vm12, %v4599_v58  ;;  %v4424_v15 = vpack.c.bf16 %v1905_v13, %v1904_v12  ;;  %v2534_v12 = vld [vmem:[#allocation2 + $0x108] sm:$0xff]  ;;  %v2535_v13 = vld [vmem:[#allocation2 + $0x110] sm:$0xff] }
 0x71d   :  { %4411 = vmatprep.subr.bf16.mxu1 %v4597_v57 }
 0x71e   :  { %4425 = vmatpush3.bf16.msra.mxu0 %v4424_v15  ;;  %v2536_v15 = vld [vmem:[#allocation2 + $0x118] sm:$0xff] }
 0x71f   :  { %4426 = vmatprep.subr.bf16.mxu0 %v4597_v57  ;;  %v4436_v16 = vpack.c.bf16 %v2536_v15, %v2535_v13 }
 0x722   :  { %4428 = vmatpush3.bf16.msra.mxu0 %v4427_v17  ;;  %v2537_v17 = vld [vmem:[#allocation2 + $0x120] sm:$0xff] }
 0x723   :  { %4129 = vmatmul.mubr.f32.vlgmr.msra.gmra.mrb[10].mxu1 %v1379_v4  ;;  %4429 = vmatprep.subr.bf16.mxu0 %v4597_v57 }
 0x724   :  { %4413 = vmatpush3.bf16.msra.mxu1 %v4397_v22  ;;  %4135 = vmatprep.mubr.msk.f32.mxu1 %vm4598_vm12, %v4599_v58  ;;  %v4430_v22 = vpack.c.bf16 %v1909_v21, %v1908_v18  ;;  %v2538_v18 = vld [vmem:[#allocation2 + $0x128] sm:$0xff] }
 0x725   :  { %4414 = vmatprep.subr.bf16.mxu1 %v4597_v57  ;;  %v4440_v21 = vpack.c.bf16 %v2538_v18, %v2537_v17 }
 0x726   :  { %4431 = vmatpush3.bf16.msra.mxu0 %v4430_v22  ;;  %v2539_v22 = vld [vmem:[#allocation2 + $0x130] sm:$0xff] }
 0x72b   :  { %4136 = vmatmul.mubr.f32.vlgmr.msra.gmra.mrb[10].mxu1 %v1379_v4 }
 0x72c   :  { %4150 = vmatprep.mubr.msk.f32.mxu1 %vm4598_vm12, %v4599_v58  ;;  %4416 = vmatpush3.bf16.msra.mxu1 %v4415_v45  ;;  %v2063_v45 = vand.u32 4294901760, %v1992_v40 }
 0x72d   :  { %4417 = vmatprep.subr.bf16.mxu1 %v4597_v57 }
 0x730   :  { %4419 = vmatpush3.bf16.msra.mxu1 %v4418_v49 }
 0x731   :  { %4420 = vmatprep.subr.bf16.mxu1 %v4597_v57 }
 0x734   :  { %4422 = vmatpush3.bf16.msra.mxu1 %v4421_v56 }
 0x7d6   :  { %v1385_v50 = vpop.f32.mrb[6].mxu0 }
 0x7d7   :  { %v4102_v51 = vpop.f32.mrb[7].mxu0 }
 0x7fe   :  { %v1767_v59 = vpop.f32.mrb[10].mxu1 }
 0x7ff   :  { %v4504_v58 = vadd.f32 %v1767_v59, %v1385_v50  ;;  %v4137_v60 = vpop.f32.mrb[11].mxu1  ;;  %v3782_v59 = vld [vmem:[#allocation2 + $0xf8] ss:$0 sm:$0xff] }
 0x801   :  { %v1782_v61 = vrot.slane %v4504_v58, 1  ;;  %1792 = vrot.lane.b32.xlu0 %v4504_v58, %s4595_s30  ;;  %v1772_v0 = vrot.slane %v4504_v58, 7 }
 0x803   :  { %v1791_v63 = vmul.f32 %v1789_v62, %v1782_v61  ;;  %v1781_v5 = vmul.f32 %v1779_v1, %v1772_v0 }
 0x805   :  { %1796 = vrot.lane.b32.xlu1 %v1791_v63, %s4596_s3 }
 0x873   :  { %v1793_v4 = vpop.permute.xlu0 %1792 }
 0x874   :  { %v1799_v6 = vsel %vm338_vm8, %v1781_v5, %v1793_v4 }
 0x877   :  { %v1797_v7 = vpop.permute.xlu1 %1796 }
 0x878   :  { %v1800_v8 = vsel %vm476_vm10, %v1799_v6, %v1797_v7 }
 0x879   :  { %4151 = vmatmul.mubr.msk.f32.vlgmr.msra.gmra.mrb[12].mxu1 %vm1213_vm11, %v1800_v8  ;;  %v2533_v8 = vld [vmem:[#allocation2 + $0x100] sm:$0xff] }
 0x87a   :  { %v4432_v14 = vpack.c.bf16 %v2534_v12, %v2533_v8  ;;  %v3784_v8 = vld [vmem:[#allocation2 + $0x160] ss:$0 sm:$0xff]  ;;  %v2674_v12 = vld [vmem:[#allocation2 + $0x178] sm:$0xff] }
 0x87c   :  { %4433 = vmatprep.subr.bf16.mxu0 %v4432_v14 }
 0x94c   :  { %v1881_v10 = vpop.f32.mrb[12].mxu1 }
 0x94d   :  { %v1882_v11 = vadd.f32 %v3780_v23, %v1881_v10  ;;  %v4152_v24 = vpop.f32.mrb[13].mxu1  ;;  %v2540_v23 = vld [vmem:[#allocation2 + $0x138] sm:$0xff] }
 0x94e   :  { %v4444_v10 = vpack.c.bf16 %v2540_v23, %v2539_v22  ;;  %v2542_v24 = vld [vmem:[#allocation2 + $0x148] sm:$0xff] }
 0x94f   :  { %v1885_v25 = vmax.f32 %v1882_v11, 0.0  ;;  %v2541_v11 = vld [vmem:[#allocation2 + $0x140] sm:$0xff] }
 0x951   :  { %v1891_v26 = vrot.slane %v1885_v25, 1  ;;  %1895 = vrot.lane.b32.xlu0 %v1885_v25, %s4595_s30  ;;  %v1887_v57 = vrot.slane %v1885_v25, 7  ;;  %v4448_v25 = vpack.c.bf16 %v2542_v24, %v2541_v11 }
 0x953   :  { %v1894_v28 = vmul.f32 %v1891_v26, %v1789_v62  ;;  %v1890_v31 = vmul.f32 %v1887_v57, %v1779_v1  ;;  %v2543_v26 = vld [vmem:[#allocation2 + $0x150] sm:$0xff] }
 0x955   :  { %2486 = vrot.lane.b32.xlu0 %v4831_v3, %s4595_s30  ;;  %1899 = vrot.lane.b32.xlu1 %v1894_v28, %s4596_s3  ;;  %v2064_v3 = vsub.f32 %v1992_v40, %v2063_v45  ;;  %v2544_v28 = vld [vmem:[#allocation2 + $0x158] sm:$0xff] }
 0x956   :  { %v4452_v57 = vpack.c.bf16 %v2544_v28, %v2543_v26 }
 0x957   :  { %v2065_v48 = vand.u32 4294901760, %v2064_v3 }
 0x959   :  { %2488 = vrot.lane.b32.xlu1 %v4829_v2, %s4595_s30  ;;  %v2066_v49 = vsub.f32 %v2064_v3, %v2065_v48  ;;  %v1990_v2 = vld [vmem:[#allocation2 + $0x1f8] sm:$0xff] }
 0x95a   :  { %v1995_v51 = vsel %vm150_vm6, %v1990_v2, 0 }
 0x95b   :  { %v2067_v50 = vand.u32 4294901760, %v2066_v49  ;;  %v2073_v52 = vand.u32 4294901760, %v1995_v51 }
 0x95d   :  { %4170 = vmatprep.mubr.f32.mxu1 %v2067_v50  ;;  %v2074_v53 = vsub.f32 %v1995_v51, %v2073_v52 }
 0x95f   :  { %v2075_v56 = vand.u32 4294901760, %v2074_v53 }
 0x961   :  { %v2076_v62 = vsub.f32 %v2074_v53, %v2075_v56 }
 0x963   :  { %v2077_v1 = vand.u32 4294901760, %v2076_v62 }
 0x9c3   :  { %v1896_v29 = vpop.permute.xlu0 %1895 }
 0x9c4   :  { %v1902_v35 = vsel %vm338_vm8, %v1890_v31, %v1896_v29 }
 0x9c7   :  { %v1900_v36 = vpop.permute.xlu1 %1899 }
 0x9c8   :  { %v1903_v38 = vsel %vm476_vm10, %v1902_v35, %v1900_v36  ;;  %v2487_v35 = vpop.permute.xlu0 %2486 }
 0x9c9   :  { %4166 = vmatmul.mubr.msk.f32.vlgmr.msra.gmra.mrb[8].mxu0 %vm1213_vm11, %v1903_v38 }
 0x9ca   :  { %4435 = vmatpush3.bf16.msra.mxu0 %v4432_v14 }
 0x9cb   :  { %4437 = vmatprep.subr.bf16.mxu0 %v4436_v16  ;;  %v2489_v29 = vpop.permute.xlu1 %2488 }
 0x9ce   :  { %4439 = vmatpush3.bf16.msra.mxu0 %v4436_v16 }
 0x9cf   :  { %4441 = vmatprep.subr.bf16.mxu0 %v4440_v21 }
 0x9d2   :  { %4443 = vmatpush3.bf16.msra.mxu0 %v4440_v21 }
 0x9d3   :  { %4445 = vmatprep.subr.bf16.mxu0 %v4444_v10 }
 0x9d6   :  { %4447 = vmatpush3.bf16.msra.mxu0 %v4444_v10 }
 0x9d7   :  { %4449 = vmatprep.subr.bf16.mxu0 %v4448_v25 }
 0x9da   :  { %4451 = vmatpush3.bf16.msra.mxu0 %v4448_v25 }
 0x9db   :  { %4453 = vmatprep.subr.bf16.mxu0 %v4452_v57 }
 0x9de   :  { %4455 = vmatpush3.bf16.msra.mxu0 %v4452_v57 }
 0xa9c   :  { %v1984_v58 = vpop.f32.mrb[8].mxu0 }
 0xa9d   :  { %v1985_v60 = vadd.f32 %v3782_v59, %v1984_v58  ;;  %v4167_v61 = vpop.f32.mrb[9].mxu0 }
 0xa9f   :  { %v1988_v63 = vmax.f32 %v1985_v60, 0.0 }
 0xaa1   :  { %v1998_v0 = vand.u32 4294901760, %v1988_v63 }
 0xaa3   :  { %v2085_v4 = vsub.f32 %v1988_v63, %v1998_v0  ;;  %4168 = vmatprep.subr.mxu1 %v1998_v0 }
 0xaa4   :  { %4169 = vmatpush3.msra.mxu1 %v1998_v0 }
 0xaa5   :  { %4171 = vmatmul.mubr.f32.vlgmr.msra.gmra.mrb[14].mxu1 %v2077_v1  ;;  %v2086_v5 = vand.u32 4294901760, %v2085_v4 }
 0xaa6   :  { %4175 = vmatprep.mubr.f32.mxu1 %v2063_v45 }
 0xaa7   :  { %v2087_v6 = vsub.f32 %v2085_v4, %v2086_v5 }
 0xaa9   :  { %v2088_v7 = vand.u32 4294901760, %v2087_v6  ;;  %v2673_v6 = vld [vmem:[#allocation2 + $0x170] sm:$0xff] }
 0xaab   :  { %4173 = vmatprep.subr.mxu1 %v2088_v7 }
 0xaac   :  { %4174 = vmatpush3.msra.mxu1 %v2088_v7 }
 0xaad   :  { %4176 = vmatmul.mubr.f32.vlgmr.msra.gmra.mrb[14].mxu1 %v2073_v52  ;;  %4178 = vmatprep.subr.mxu1 %v2085_v4 }
 0xaae   :  { %4179 = vmatpush3.msra.mxu1 %v2085_v4  ;;  %4180 = vmatprep.mubr.f32.mxu1 %v2064_v3 }
 0xaaf   :  { %4183 = vmatprep.subr.mxu1 %v1998_v0 }
 0xab5   :  { %4181 = vmatmul.mubr.f32.vlgmr.msra.gmra.mrb[14].mxu1 %v2074_v53 }
 0xab6   :  { %4184 = vmatpush3.msra.mxu1 %v1998_v0  ;;  %4185 = vmatprep.mubr.f32.mxu1 %v2065_v48 }
 0xab7   :  { %4188 = vmatprep.subr.mxu1 %v2086_v5 }
 0xabd   :  { %4186 = vmatmul.mubr.f32.vlgmr.msra.gmra.mrb[14].mxu1 %v2075_v56 }
 0xabe   :  { %4189 = vmatpush3.msra.mxu1 %v2086_v5  ;;  %4190 = vmatprep.mubr.f32.mxu1 %v2063_v45  ;;  %v2672_v5 = vld [vmem:[#allocation2 + $0x168] sm:$0xff] }
 0xabf   :  { %4193 = vmatprep.subr.mxu1 %v1998_v0  ;;  %v4456_v7 = vpack.c.bf16 %v2673_v6, %v2672_v5 }
 0xac5   :  { %4191 = vmatmul.mubr.f32.vlgmr.msra.gmra.mrb[14].mxu1 %v2073_v52 }
 0xac6   :  { %4194 = vmatpush3.msra.mxu1 %v1998_v0  ;;  %4195 = vmatprep.mubr.f32.mxu1 %v2063_v45 }
 0xac7   :  { %4457 = vmatprep.subr.bf16.mxu1 %v4456_v7 }
 0xacd   :  { %4196 = vmatmul.mubr.f32.vlgmr.msra.gmra.mrb[14].mxu1 %v2073_v52 }
 0xace   :  { %4459 = vmatpush3.bf16.msra.mxu1 %v4456_v7 }
 0xacf   :  { %4229 = vmatprep.subr.mxu1 %v2674_v12 }
 0xad2   :  { %4230 = vmatpush3.msra.mxu1 %v2674_v12 }
 0xba0   :  { %v4197_v31 = vpop.f32.mrb[14].mxu1 }
 0xba1   :  { %v2476_v36 = vpop.f32.mrb[15].mxu1  ;;  %v2493_v38 = vsel %vm338_vm8, %v4197_v31, %v2489_v29 }
 0xba2   :  { %2516 = vrot.lane.b32.xlu1 %v2493_v38, %s4596_s3  ;;  %v2495_v9 = vrot.slane %v2493_v38, 7  ;;  %v2506_v40 = vrot.slane %v2493_v38, 1  ;;  %v2492_v45 = vsel %vm338_vm8, %v2476_v36, %v2487_v35 }
 0xba3   :  { %2514 = vrot.lane.b32.xlu0 %v2492_v45, %s4596_s3  ;;  %v2498_v3 = vrot.slane %v2492_v45, 7  ;;  %v2505_v48 = vrot.slane %v2492_v45, 1 }
 0xba5   :  { %v2511_v49 = vsel %vm75_vm0, %v2506_v40, %v2505_v48  ;;  %v2507_v50 = vsel %vm75_vm0, %v2505_v48, %v2506_v40  ;;  %v2499_v2 = vsel %vm35_vm1, %v2498_v3, %v2495_v9  ;;  %v2502_v51 = vsel %vm35_vm1, %v2495_v9, %v2498_v3  ;;  %v2764_v48 = vld [vmem:[#allocation2 + $0x208] sm:$0xff] }
 0xba6   :  { %v2513_v52 = vmul.f32 %v2511_v49, %v4784_v47  ;;  %v2512_v53 = vmul.f32 %v2507_v50, %v4782_v46  ;;  %v2504_v58 = vmul.f32 %v2499_v2, %v4796_v55  ;;  %v2503_v60 = vmul.f32 %v2502_v51, %v4794_v54  ;;  %v2765_v49 = vld [vmem:[#allocation2 + $0x210] sm:$0xff]  ;;  %v3787_v2 = vld [vmem:[#allocation2 + $0x180] ss:$0 sm:$0xff] }
 0xba7   :  { %v2771_v50 = vsel %vm338_vm8, %v2764_v48, 0  ;;  %v2774_v51 = vsel %vm338_vm8, %v2765_v49, 0 }
 0xba8   :  { %2524 = vrot.lane.b32.xlu1 %v2513_v52, %s4600_s4  ;;  %2522 = vrot.lane.b32.xlu0 %v2512_v53, %s4600_s4  ;;  %v2766_v52 = vld [vmem:[#allocation2 + $0x218] sm:$0xff] }
 0xc14   :  { %v2517_v59 = vpop.permute.xlu1 %2516 }
 0xc15   :  { %v2515_v56 = vpop.permute.xlu0 %2514  ;;  %v2529_v61 = vsel %vm476_vm10, %v2504_v58, %v2517_v59 }
 0xc16   :  { %v2528_v62 = vsel %vm476_vm10, %v2503_v60, %v2515_v56  ;;  %v4924_v56 = vand.u32 4294901760, %v2771_v50  ;;  %v4926_v60 = vand.u32 4294901760, %v2774_v51 }
 0xc1a   :  { %v2525_v63 = vpop.permute.xlu1 %2524  ;;  %v2523_v0 = vpop.permute.xlu0 %2522 }
 0xc1b   :  { %v2532_v1 = vsel %vm2530_vm13, %v2529_v61, %v2525_v63  ;;  %v2531_v4 = vsel %vm2530_vm13, %v2528_v62, %v2523_v0  ;;  %v2777_v61 = vsel %vm338_vm8, %v2766_v52, 0  ;;  %v2857_v63 = vsub.f32 %v2771_v50, %v4924_v56 }
 0xc1c   :  { %4222 = vmatprep.mubr.msk.f32.mxu0 %vm2550_vm14, %v2531_v4  ;;  %v2876_v5 = vand.u32 4294901760, %v2777_v61 }
 0xc1d   :  { %4223 = vmatmul.mubr.msk.f32.vlgmr.msra.gmra.mrb[10].mxu0 %vm2550_vm14, %v2532_v1  ;;  %v2867_v1 = vsub.f32 %v2774_v51, %v4926_v60  ;;  %v2858_v6 = vand.u32 4294901760, %v2857_v63 }
 0xcf0   :  { %v4224_v13 = vpop.f32.mrb[10].mxu0 }
 0xcf1   :  { %v2629_v14 = vadd.f32 %v4224_v13, %v3784_v8  ;;  %v2623_v15 = vpop.f32.mrb[11].mxu0  ;;  %v2877_v13 = vsub.f32 %v2777_v61, %v2876_v5 }
 0xcf2   :  { %v2624_v16 = vadd.f32 %v3784_v8, %v2623_v15  ;;  %v2868_v8 = vand.u32 4294901760, %v2867_v1 }
 0xcf3   :  { %v2633_v17 = vmax.f32 %v2629_v14, 0.0  ;;  %v2859_v14 = vsub.f32 %v2857_v63, %v2858_v6 }
 0xcf4   :  { %v2632_v18 = vmax.f32 %v2624_v16, 0.0  ;;  %v2869_v16 = vsub.f32 %v2867_v1, %v2868_v8 }
 0xcf5   :  { %v2635_v21 = vrot.slane %v2633_v17, 7  ;;  %v2646_v22 = vrot.slane %v2633_v17, 1  ;;  %2656 = vrot.lane.b32.xlu1 %v2633_v17, %s4591_s20 }
 0xcf6   :  { %v2638_v23 = vrot.slane %v2632_v18, 7  ;;  %v2645_v10 = vrot.slane %v2632_v18, 1  ;;  %2654 = vrot.lane.b32.xlu0 %v2632_v18, %s4591_s20 }
 0xcf8   :  { %v2651_v11 = vsel %vm75_vm0, %v2646_v22, %v2645_v10  ;;  %v2647_v24 = vsel %vm75_vm0, %v2645_v10, %v2646_v22  ;;  %v2639_v25 = vsel %vm35_vm1, %v2638_v23, %v2635_v21  ;;  %v2642_v26 = vsel %vm35_vm1, %v2635_v21, %v2638_v23 }
 0xcf9   :  { %v2653_v28 = vmul.f32 %v2651_v11, %v4784_v47  ;;  %v2652_v57 = vmul.f32 %v2647_v24, %v4782_v46  ;;  %v2644_v46 = vmul.f32 %v2639_v25, %v4796_v55  ;;  %v2643_v31 = vmul.f32 %v2642_v26, %v4794_v54 }
 0xcfa   :  { %v2878_v21 = vand.u32 4294901760, %v2877_v13  ;;  %v2860_v11 = vand.u32 4294901760, %v2859_v14  ;;  %v2870_v26 = vand.u32 4294901760, %v2869_v16 }
 0xcfb   :  { %2664 = vrot.lane.b32.xlu1 %v2653_v28, %s4595_s30  ;;  %2662 = vrot.lane.b32.xlu0 %v2652_v57, %s4595_s30 }
 0xcfc   :  { %v2879_v24 = vsub.f32 %v2877_v13, %v2878_v21 }
 0xcff   :  { %3369 = vrot.lane.b32.xlu1 %v4748_v19, %s4591_s20  ;;  %3367 = vrot.lane.b32.xlu0 %v4750_v20, %s4591_s20 }
 0xd03   :  { %3373 = vrot.lane.b32.xlu1 %v4754_v27, %s4591_s20  ;;  %3371 = vrot.lane.b32.xlu0 %v4757_v30, %s4591_s20  ;;  %v2763_v27 = vld [vmem:[#allocation2 + $0x200] sm:$0xff] }
 0xd04   :  { %v2768_v30 = vsel %vm338_vm8, %v2763_v27, 0 }
 0xd05   :  { %v4912_v55 = vand.u32 4294901760, %v2768_v30 }
 0xd07   :  { %4248 = vmatprep.mubr.f32.mxu0 %v4912_v55  ;;  %v4916_v54 = vsub.f32 %v2768_v30, %v4912_v55  ;;  %v3459_v30 = vld [vmem:[#allocation2 + $0x198] sm:$0xff] }
 0xd09   :  { %v2848_v40 = vand.u32 4294901760, %v4916_v54 }
 0xd0b   :  { %v2849_v45 = vsub.f32 %v4916_v54, %v2848_v40 }
 0xd0d   :  { %v2850_v3 = vand.u32 4294901760, %v2849_v45  ;;  %v3462_v45 = vld [vmem:[#allocation2 + $0x1b0] sm:$0xff] }
 0xd67   :  { %v2657_v47 = vpop.permute.xlu1 %2656 }
 0xd68   :  { %v2655_v29 = vpop.permute.xlu0 %2654  ;;  %v2669_v35 = vsel %vm150_vm6, %v2644_v46, %v2657_v47  ;;  %v2880_v46 = vand.u32 4294901760, %v2879_v24 }
 0xd69   :  { %v2668_v36 = vsel %vm150_vm6, %v2643_v31, %v2655_v29 }
 0xd6d   :  { %v2665_v19 = vpop.permute.xlu1 %2664  ;;  %v2663_v38 = vpop.permute.xlu0 %2662 }
 0xd6e   :  { %v2671_v20 = vsel %vm338_vm8, %v2669_v35, %v2665_v19  ;;  %v2670_v9 = vsel %vm338_vm8, %v2668_v36, %v2663_v38  ;;  %v3457_v35 = vld [vmem:[#allocation2 + $0x188] sm:$0xff]  ;;  %v3458_v36 = vld [vmem:[#allocation2 + $0x190] sm:$0xff] }
 0xd6f   :  { %4231 = vmatprep.mubr.msk.f32.mxu1 %vm351_vm9, %v2670_v9  ;;  %v4484_v19 = vpack.c.bf16 %v3458_v36, %v3457_v35 }
 0xd70   :  { %4232 = vmatmul.mubr.msk.f32.vlgmr.msra.gmra.mrb[16].mxu1 %vm351_vm9, %v2671_v20 }
 0xd71   :  { %4238 = vmatprep.mubr.f32.mxu1 %v2850_v3  ;;  %v3370_v48 = vpop.permute.xlu1 %3369  ;;  %v3368_v50 = vpop.permute.xlu0 %3367 }
 0xe43   :  { %v4233_v53 = vpop.f32.mrb[16].mxu1 }
 0xe44   :  { %v2758_v59 = vadd.f32 %v4233_v53, %v3787_v2  ;;  %v2752_v58 = vpop.f32.mrb[17].mxu1 }
 0xe45   :  { %v2753_v62 = vadd.f32 %v3787_v2, %v2752_v58 }
 0xe46   :  { %v2762_v0 = vmax.f32 %v2758_v59, 0.0 }
 0xe47   :  { %v2761_v4 = vmax.f32 %v2753_v62, 0.0 }
 0xe48   :  { %v2783_v7 = vand.u32 4294901760, %v2762_v0 }
 0xe49   :  { %v2780_v12 = vand.u32 4294901760, %v2761_v4 }
 0xe4a   :  { %v2895_v15 = vsub.f32 %v2762_v0, %v2783_v7 }
 0xe4b   :  { %v4460_v17 = vpack.c.bf16 %v2783_v7, %v2780_v12  ;;  %v2888_v18 = vsub.f32 %v2761_v4, %v2780_v12 }
 0xe4c   :  { %v2896_v22 = vand.u32 4294901760, %v2895_v15 }
 0xe4d   :  { %v2889_v23 = vand.u32 4294901760, %v2888_v18  ;;  %4461 = vmatprep.subr.bf16.mxu1 %v4460_v17  ;;  %v4468_v10 = vpack.c.bf16 %v2895_v15, %v2888_v18 }
 0xe4e   :  { %4463 = vmatpush3.bf16.msra.mxu1 %v4460_v17  ;;  %v2897_v25 = vsub.f32 %v2895_v15, %v2896_v22 }
 0xe4f   :  { %v2890_v28 = vsub.f32 %v2888_v18, %v2889_v23  ;;  %v4476_v57 = vpack.c.bf16 %v2896_v22, %v2889_v23  ;;  %4485 = vmatprep.subr.bf16.mxu1 %v4484_v19 }
 0xe50   :  { %v2898_v29 = vand.u32 4294901760, %v2897_v25 }
 0xe51   :  { %v2891_v47 = vand.u32 4294901760, %v2890_v28  ;;  %4239 = vmatmul.mubr.f32.vlgmr.msra.gmra.mrb[18].mxu1 %v2860_v11 }
 0xe52   :  { %4241 = vmatprep.mubr.f32.mxu1 %v2870_v26  ;;  %4487 = vmatpush3.bf16.msra.mxu1 %v4484_v19 }
 0xe53   :  { %v4464_v31 = vpack.c.bf16 %v2898_v29, %v2891_v47 }
 0xe55   :  { %4465 = vmatprep.subr.bf16.mxu0 %v4464_v31  ;;  %4242 = vmatmul.mubr.f32.gmra.mrb[20].mxu1 %v2880_v46 }
 0xe56   :  { %4467 = vmatpush3.bf16.msra.mxu0 %v4464_v31 }
 0xe57   :  { %4469 = vmatprep.subr.bf16.mxu0 %v4468_v10 }
 0xe59   :  { %4249 = vmatmul.mubr.f32.vlgmr.msra.gmra.mrb[12].mxu0 %v4924_v56 }
 0xe5a   :  { %4471 = vmatpush3.bf16.msra.mxu0 %v4468_v10  ;;  %4251 = vmatprep.mubr.f32.mxu0 %v4926_v60 }
 0xe5b   :  { %4473 = vmatprep.subr.bf16.mxu0 %v4460_v17 }
 0xe5d   :  { %4252 = vmatmul.mubr.f32.gmra.mrb[14].mxu0 %v2876_v5 }
 0xe5e   :  { %4258 = vmatprep.mubr.f32.mxu0 %v4916_v54  ;;  %v3460_v54 = vld [vmem:[#allocation2 + $0x1a0] sm:$0xff] }
 0xe61   :  { %4259 = vmatmul.mubr.f32.vlgmr.msra.gmra.mrb[12].mxu0 %v2857_v63 }
 0xe62   :  { %4475 = vmatpush3.bf16.msra.mxu0 %v4460_v17  ;;  %4261 = vmatprep.mubr.f32.mxu0 %v2867_v1  ;;  %v3374_v1 = vpop.permute.xlu1 %3373 }
 0xe63   :  { %4477 = vmatprep.subr.bf16.mxu0 %v4476_v57 }
 0xe65   :  { %4262 = vmatmul.mubr.f32.gmra.mrb[14].mxu0 %v2877_v13 }
 0xe66   :  { %4268 = vmatprep.mubr.f32.mxu0 %v2848_v40  ;;  %v4488_v40 = vpack.c.bf16 %v3460_v54, %v3459_v30 }
 0xe68   :  { %4489 = vmatprep.subr.bf16.mxu1 %v4488_v40 }
 0xe69   :  { %4269 = vmatmul.mubr.f32.vlgmr.msra.gmra.mrb[12].mxu0 %v2858_v6  ;;  %4491 = vmatpush3.bf16.msra.mxu1 %v4488_v40 }
 0xe6a   :  { %4479 = vmatpush3.bf16.msra.mxu0 %v4476_v57  ;;  %4271 = vmatprep.mubr.f32.mxu0 %v2868_v8 }
 0xe6b   :  { %4481 = vmatprep.subr.bf16.mxu0 %v4460_v17 }
 0xe6d   :  { %4272 = vmatmul.mubr.f32.gmra.mrb[14].mxu0 %v2878_v21 }
 0xe6e   :  { %4278 = vmatprep.mubr.f32.mxu0 %v4912_v55 }
 0xe71   :  { %4279 = vmatmul.mubr.f32.vlgmr.msra.gmra.mrb[12].mxu0 %v4924_v56 }
 0xe72   :  { %4483 = vmatpush3.bf16.msra.mxu0 %v4460_v17  ;;  %4281 = vmatprep.mubr.f32.mxu0 %v4926_v60 }
 0xe75   :  { %4282 = vmatmul.mubr.f32.gmra.mrb[14].mxu0 %v2876_v5 }
 0xe76   :  { %4288 = vmatprep.mubr.f32.mxu0 %v4912_v55  ;;  %v3461_v55 = vld [vmem:[#allocation2 + $0x1a8] sm:$0xff] }
 0xe77   :  { %v4492_v3 = vpack.c.bf16 %v3462_v45, %v3461_v55 }
 0xe79   :  { %4289 = vmatmul.mubr.f32.vlgmr.msra.gmra.mrb[12].mxu0 %v4924_v56  ;;  %4493 = vmatprep.subr.bf16.mxu1 %v4492_v3 }
 0xe7a   :  { %4291 = vmatprep.mubr.f32.mxu0 %v4926_v60  ;;  %4495 = vmatpush3.bf16.msra.mxu1 %v4492_v3 }
 0xe7d   :  { %4292 = vmatmul.mubr.f32.gmra.mrb[14].mxu0 %v2876_v5  ;;  %v3372_v5 = vpop.permute.xlu0 %3371 }
 0xf24   :  { %v4240_v38 = vpop.f32.mrb[18].mxu1 }
 0xf25   :  { %v2852_v20 = vpop.f32.mrb[19].mxu1 }
 0xf28   :  { %v4243_v9 = vpop.f32.mrb[20].mxu1 }
 0xf29   :  { %v2872_v27 = vpop.f32.mrb[21].mxu1 }
 0xf4c   :  { %v4290_v49 = vpop.f32.mrb[12].mxu0 }
 0xf4d   :  { %v4505_v2 = vadd.f32 %v4290_v49, %v4240_v38  ;;  %v3345_v51 = vpop.f32.mrb[13].mxu0  ;;  %v3643_v49 = vld [vmem:[#allocation2 + $0x1c0] sm:$0xff] }
 0xf4e   :  { %v4506_v52 = vadd.f32 %v3345_v51, %v2852_v20 }
 0xf4f   :  { %v3380_v53 = vsel %vm150_vm6, %v4505_v2, %v3370_v48  ;;  %v3790_v2 = vld [vmem:[#allocation2 + $0x1b8] ss:$0 sm:$0xff] }
 0xf50   :  { %v4293_v56 = vpop.f32.mrb[14].mxu0  ;;  %3423 = vrot.lane.b32.xlu1 %v3380_v53, %s4595_s30  ;;  %v3390_v59 = vrot.slane %v3380_v53, 7  ;;  %v3405_v58 = vrot.slane %v3380_v53, 1  ;;  %v3379_v60 = vsel %vm150_vm6, %v4506_v52, %v3368_v50  ;;  %v3644_v50 = vld [vmem:[#allocation2 + $0x1c8] sm:$0xf] }
 0xf51   :  { %v4507_v61 = vadd.f32 %v4293_v56, %v4243_v9  ;;  %v3357_v62 = vpop.f32.mrb[15].mxu0  ;;  %3421 = vrot.lane.b32.xlu0 %v3379_v60, %s4595_s30  ;;  %v3389_v63 = vrot.slane %v3379_v60, 7  ;;  %v3404_v0 = vrot.slane %v3379_v60, 1  ;;  %v4496_v51 = vpack.c.bf16 %v3644_v50, %v3643_v49 }
 0xf52   :  { %v4508_v4 = vadd.f32 %v3357_v62, %v2872_v27 }
 0xf53   :  { %v3382_v6 = vsel %vm150_vm6, %v4507_v61, %v3374_v1  ;;  %v3406_v7 = vsel %vm75_vm0, %v3404_v0, %v3405_v58  ;;  %v3391_v8 = vsel %vm35_vm1, %v3389_v63, %v3390_v59  ;;  %4498 = vmatprep.subr.msk.bf16.mxu1 %vm4653_vm4, %v4496_v51 }
 0xf54   :  { %3427 = vrot.lane.b32.xlu1 %v3382_v6, %s4595_s30  ;;  %v3384_v12 = vrot.slane %v3382_v6, 7  ;;  %v3409_v13 = vrot.slane %v3382_v6, 1  ;;  %v3381_v14 = vsel %vm150_vm6, %v4508_v4, %v3372_v5  ;;  %v3417_v21 = vmul.f32 %v3406_v7, %v4663_v34 }
 0xf55   :  { %3425 = vrot.lane.b32.xlu0 %v3381_v14, %s4595_s30  ;;  %v3392_v15 = vrot.slane %v3381_v14, 7  ;;  %v3407_v16 = vrot.slane %v3381_v14, 1  ;;  %v3401_v31 = vmul.f32 %v3391_v8, %v4679_v42 }
 0xf56   :  { %v3416_v17 = vsel %vm75_vm0, %v3409_v13, %v3404_v0  ;;  %v3399_v18 = vsel %vm35_vm1, %v3384_v12, %v3389_v63 }
 0xf57   :  { %v3408_v22 = vsel %vm75_vm0, %v3405_v58, %v3407_v16  ;;  %v3410_v23 = vsel %vm75_vm0, %v3407_v16, %v3409_v13  ;;  %v3394_v11 = vsel %vm35_vm1, %v3392_v15, %v3384_v12  ;;  %v3393_v24 = vsel %vm35_vm1, %v3390_v59, %v3392_v15 }
 0xf58   :  { %v3418_v10 = vmul.f32 %v3408_v22, %v4668_v37  ;;  %v3419_v25 = vmul.f32 %v3410_v23, %v4661_v33  ;;  %v3420_v26 = vmul.f32 %v3416_v17, %v4671_v39  ;;  %v3400_v46 = vmul.f32 %v3399_v18, %v4677_v41 }
 0xf59   :  { %3437 = vrot.lane.b32.xlu0 %v3417_v21, %s4596_s3  ;;  %v3402_v9 = vmul.f32 %v3393_v24, %v4681_v43  ;;  %v3403_v30 = vmul.f32 %v3394_v11, %v4683_v44 }
 0xf5a   :  { %3439 = vrot.lane.b32.xlu1 %v3418_v10, %s4596_s3 }
 0xf5d   :  { %3441 = vrot.lane.b32.xlu0 %v3419_v25, %s4596_s3 }
 0xf5e   :  { %3443 = vrot.lane.b32.xlu1 %v3420_v26, %s4596_s3 }
 0xfc2   :  { %v3424_v28 = vpop.permute.xlu1 %3423 }
 0xfc3   :  { %v3422_v57 = vpop.permute.xlu0 %3421  ;;  %v3450_v19 = vsel %vm338_vm8, %v3401_v31, %v3424_v28 }
 0xfc4   :  { %v3449_v35 = vsel %vm338_vm8, %v3400_v46, %v3422_v57 }
 0xfc6   :  { %v3428_v47 = vpop.permute.xlu1 %3427 }
 0xfc7   :  { %v3426_v29 = vpop.permute.xlu0 %3425  ;;  %v3452_v55 = vsel %vm338_vm8, %v3403_v30, %v3428_v47 }
 0xfc8   :  { %v3451_v54 = vsel %vm338_vm8, %v3402_v9, %v3426_v29 }
 0xfcb   :  { %v3438_v36 = vpop.permute.xlu0 %3437 }
 0xfcc   :  { %v3453_v38 = vsel %vm476_vm10, %v3449_v35, %v3438_v36  ;;  %v3440_v20 = vpop.permute.xlu1 %3439 }
 0xfcd   :  { %v3454_v27 = vsel %vm476_vm10, %v3450_v19, %v3440_v20  ;;  %4306 = vmatprep.mubr.msk.f32.mxu1 %vm1213_vm11, %v3453_v38 }
 0xfce   :  { %4307 = vmatmul.mubr.msk.f32.vlgmr.msra.gmra.mrb[22].mxu1 %vm1213_vm11, %v3454_v27 }
 0xfcf   :  { %v3442_v40 = vpop.permute.xlu0 %3441  ;;  %4501 = vmatpush3.bf16.msk.msra.mxu1 %vm4653_vm4, %v4496_v51 }
 0xfd0   :  { %v3455_v45 = vsel %vm476_vm10, %v3451_v54, %v3442_v40  ;;  %v3444_v3 = vpop.permute.xlu1 %3443 }
 0xfd1   :  { %v3456_v48 = vsel %vm476_vm10, %v3452_v55, %v3444_v3  ;;  %4309 = vmatprep.mubr.msk.f32.mxu1 %vm1213_vm11, %v3455_v45 }
 0xfd2   :  { %4310 = vmatmul.mubr.msk.f32.gmra.mrb[24].mxu1 %vm1213_vm11, %v3456_v48 }
0x10a1   :  { %v4308_v52 = vpop.f32.mrb[22].mxu1 }
0x10a2   :  { %v3552_v53 = vadd.f32 %v4308_v52, %v3790_v2  ;;  %v3546_v56 = vpop.f32.mrb[23].mxu1 }
0x10a3   :  { %v3547_v59 = vadd.f32 %v3790_v2, %v3546_v56 }
0x10a4   :  { %v3566_v58 = vmax.f32 %v3552_v53, 0.0 }
0x10a5   :  { %v3565_v60 = vmax.f32 %v3547_v59, 0.0  ;;  %v4311_v61 = vpop.f32.mrb[24].mxu1 }
0x10a6   :  { %v3576_v62 = vrot.slane %v3566_v58, 7  ;;  %v3591_v63 = vrot.slane %v3566_v58, 1  ;;  %v3562_v0 = vadd.f32 %v4311_v61, %v3790_v2  ;;  %3609 = vrot.lane.b32.xlu1 %v3566_v58, %s4593_s0  ;;  %v3556_v1 = vpop.f32.mrb[25].mxu1 }
0x10a7   :  { %v3575_v4 = vrot.slane %v3565_v60, 7  ;;  %v3590_v5 = vrot.slane %v3565_v60, 1  ;;  %v3557_v6 = vadd.f32 %v3790_v2, %v3556_v1  ;;  %3607 = vrot.lane.b32.xlu0 %v3565_v60, %s4593_s0 }
0x10a8   :  { %v3568_v7 = vmax.f32 %v3562_v0, 0.0 }
0x10a9   :  { %v3567_v8 = vmax.f32 %v3557_v6, 0.0  ;;  %v3592_v32 = vsel %vm75_vm0, %v3590_v5, %v3591_v63  ;;  %v3577_v12 = vsel %vm35_vm1, %v3575_v4, %v3576_v62 }
0x10aa   :  { %v3570_v13 = vrot.slane %v3568_v7, 7  ;;  %v3595_v14 = vrot.slane %v3568_v7, 1  ;;  %3613 = vrot.lane.b32.xlu1 %v3568_v7, %s4593_s0  ;;  %v3603_v21 = vmul.f32 %v3592_v32, %v4663_v34  ;;  %v3587_v47 = vmul.f32 %v3577_v12, %v4679_v42 }
0x10ab   :  { %v3578_v15 = vrot.slane %v3567_v8, 7  ;;  %v3593_v16 = vrot.slane %v3567_v8, 1  ;;  %3611 = vrot.lane.b32.xlu0 %v3567_v8, %s4593_s0 }
0x10ac   :  { %v3602_v17 = vsel %vm75_vm0, %v3595_v14, %v3590_v5  ;;  %v3585_v18 = vsel %vm35_vm1, %v3570_v13, %v3575_v4 }
0x10ad   :  { %v3594_v22 = vsel %vm75_vm0, %v3591_v63, %v3593_v16  ;;  %v3596_v23 = vsel %vm75_vm0, %v3593_v16, %v3595_v14  ;;  %v3580_v11 = vsel %vm35_vm1, %v3578_v15, %v3570_v13  ;;  %v3579_v24 = vsel %vm35_vm1, %v3576_v62, %v3578_v15 }
0x10ae   :  { %v3604_v10 = vmul.f32 %v3594_v22, %v4668_v37  ;;  %v3605_v25 = vmul.f32 %v3596_v23, %v4661_v33  ;;  %v3606_v26 = vmul.f32 %v3602_v17, %v4671_v39  ;;  %v3586_v29 = vmul.f32 %v3585_v18, %v4677_v41 }
0x10af   :  { %3623 = vrot.lane.b32.xlu0 %v3603_v21, %s4591_s20  ;;  %v3588_v36 = vmul.f32 %v3579_v24, %v4681_v43  ;;  %v3589_v38 = vmul.f32 %v3580_v11, %v4683_v44  ;;  %v3795_v43 = vld [vmem:[#allocation2 + $0x1d0] ss:$0 sm:$0xff] }
0x10b0   :  { %3625 = vrot.lane.b32.xlu1 %v3604_v10, %s4591_s20 }
0x10b3   :  { %3627 = vrot.lane.b32.xlu0 %v3605_v25, %s4591_s20 }
0x10b4   :  { %3629 = vrot.lane.b32.xlu1 %v3606_v26, %s4591_s20 }
0x1118   :  { %v3610_v34 = vpop.permute.xlu1 %3609 }
0x1119   :  { %v3608_v28 = vpop.permute.xlu0 %3607  ;;  %v3636_v35 = vsel %vm145_vm5, %v3587_v47, %v3610_v34 }
0x111a   :  { %v3635_v46 = vsel %vm145_vm5, %v3586_v29, %v3608_v28 }
0x111c   :  { %v3614_v37 = vpop.permute.xlu1 %3613 }
0x111d   :  { %v3612_v57 = vpop.permute.xlu0 %3611  ;;  %v3638_v20 = vsel %vm145_vm5, %v3589_v38, %v3614_v37 }
0x111e   :  { %v3637_v41 = vsel %vm145_vm5, %v3588_v36, %v3612_v57 }
0x1121   :  { %v3624_v31 = vpop.permute.xlu0 %3623 }
0x1122   :  { %v3639_v33 = vsel %vm150_vm6, %v3635_v46, %v3624_v31  ;;  %v3626_v39 = vpop.permute.xlu1 %3625 }
0x1123   :  { %v3640_v19 = vsel %vm150_vm6, %v3636_v35, %v3626_v39  ;;  %4316 = vmatprep.mubr.msk.f32.mxu1 %vm162_vm7, %v3639_v33 }
0x1124   :  { %4317 = vmatmul.mubr.msk.f32.vlgmr.msra.gmra.mrb[26].mxu1 %vm162_vm7, %v3640_v19 }
0x1125   :  { %v3628_v42 = vpop.permute.xlu0 %3627 }
0x1126   :  { %v3641_v9 = vsel %vm150_vm6, %v3637_v41, %v3628_v42  ;;  %v3630_v27 = vpop.permute.xlu1 %3629 }
0x1127   :  { %v3642_v30 = vsel %vm150_vm6, %v3638_v20, %v3630_v27  ;;  %4319 = vmatprep.mubr.msk.f32.mxu1 %vm162_vm7, %v3641_v9 }
0x1128   :  { %4320 = vmatmul.mubr.msk.f32.gmra.mrb[28].mxu1 %vm162_vm7, %v3642_v30 }
0x11f7   :  { %v4318_v54 = vpop.f32.mrb[26].mxu1 }
0x11f8   :  { %v3737_v40 = vadd.f32 %v4318_v54, %v3795_v43  ;;  %v3731_v44 = vpop.f32.mrb[27].mxu1 }
0x11f9   :  { %v3732_v55 = vadd.f32 %v3795_v43, %v3731_v44 }
0x11fa   :  { %v3751_v45 = vmax.f32 %v3737_v40, 0.0 }
0x11fb   :  { %v3750_v3 = vmax.f32 %v3732_v55, 0.0  ;;  %v4321_v48 = vpop.f32.mrb[28].mxu1 }
0x11fc   :  { %3755 = vst.msk [vmem:[%s5040_s2 + $0x8] sm:$0xff] %vm145_vm5, %v3751_v45  ;;  %v3747_v49 = vadd.f32 %v4321_v48, %v3795_v43  ;;  %v3741_v50 = vpop.f32.mrb[29].mxu1 }
0x11fd   :  { %3754 = vst.msk [vmem:[%s5040_s2] sm:$0xff] %vm145_vm5, %v3750_v3  ;;  %v3742_v2 = vadd.f32 %v3795_v43, %v3741_v50 }
0x11fe   :  { %v3753_v51 = vmax.f32 %v3747_v49, 0.0 }
0x11ff   :  { %v3752_v52 = vmax.f32 %v3742_v2, 0.0 }
0x1200   :  { %3757 = vst.msk [vmem:[%s5040_s2 + $0x18] sm:$0xff] %vm145_vm5, %v3753_v51 }
0x1201   :  { %3756 = vst.msk [vmem:[%s5040_s2 + $0x10] sm:$0xff] %vm145_vm5, %v3752_v52 }
0x1202   :  { %3762 = vsyncpa [#allocation3], 1 }

</bundles_post_ra>
